<compile_context>
chip_gen: v7x
topology: tpu7x:2x2x1
jax: 0.10.0
libtpu: 0.0.40
codegen_flags: <defaults>
</compile_context>

<pallas_src>
import jax
import jax.numpy as jnp
from jax import lax
from jax.experimental import pallas as pl
from jax.experimental.pallas import tpu as pltpu

EPS = 1e-3  # BatchNorm2d(eps=0.001)


def conv_bn_kernel(w_ref, x_ref, gamma_ref, beta_ref, o_ref):
    # 1x1 conv == matmul: (Cout, Cin) @ (Cin, M) -> (Cout, M), f32 accumulate.
    y = jnp.dot(w_ref[...], x_ref[...], preferred_element_type=jnp.float32)

    # BatchNorm2d training-mode batch stats per channel (row), single pass:
    # scale = gamma * rsqrt(E[y^2] - E[y]^2 + eps); shift = beta - mean*scale.
    m = y.shape[1]
    inv_m = 1.0 / m
    s1 = jnp.sum(y, axis=1, keepdims=True)        # (Cout, 1)
    s2 = jnp.sum(y * y, axis=1, keepdims=True)    # (Cout, 1)
    mean = s1 * inv_m
    var = s2 * inv_m - mean * mean                # biased variance (÷M)
    inv_std = lax.rsqrt(var + EPS)
    scale = gamma_ref[...] * inv_std              # (Cout, 1)
    shift = beta_ref[...] - mean * scale          # (Cout, 1)

    o_ref[...] = (y * scale + shift).astype(o_ref.dtype)


def conv2d_batchnorm(x_nchw, w_oihw, gamma, beta):
    """Conv2d(768->192, 1x1, bias=False) + BatchNorm2d(192) fused Pallas kernel.

    x_nchw: (N, Cin, H, W) float32
    w_oihw: (Cout, Cin, 1, 1) float32
    gamma, beta: (Cout,) float32
    returns: (N, Cout, H, W) float32
    """
    n, cin, h, w = x_nchw.shape
    cout = w_oihw.shape[0]
    m = n * h * w

    # Glue in (Cout, M) orientation. For N=1 these are pure reshapes (free);
    # only the N>1 case needs a transpose on each side.
    if n == 1:
        x_mat = x_nchw.reshape(cin, m)
    else:
        x_mat = jnp.transpose(x_nchw, (1, 0, 2, 3)).reshape(cin, m)
    w_mat = w_oihw.reshape(cout, cin)             # no transpose needed
    gamma2 = gamma.reshape(cout, 1)
    beta2 = beta.reshape(cout, 1)

    # Single grid step: problem is tiny (~42 MFLOP, ~1.2 MB resident), so
    # tiling would only add per-step overhead. Cost estimate helps XLA
    # schedule surrounding ops.
    cost = pl.CostEstimate(
        flops=2 * m * cin * cout,
        transcendentals=cout,
        bytes_accessed=4 * (cin * m + cout * cin + cout * m + 2 * cout),
    )

    # NOTE: bf16 input casting (halves DMA bytes) is skipped — it fails the
    # 1e-3 accuracy gate for this synthetic data; keep f32 end-to-end.
    out_mat = pl.pallas_call(
        conv_bn_kernel,
        out_shape=jax.ShapeDtypeStruct((cout, m), x_nchw.dtype),
        grid=(1,),
        in_specs=[
            pl.BlockSpec((cout, cin), lambda i: (0, 0)),
            pl.BlockSpec((cin, m), lambda i: (0, 0)),
            pl.BlockSpec((cout, 1), lambda i: (0, 0)),
            pl.BlockSpec((cout, 1), lambda i: (0, 0)),
        ],
        out_specs=pl.BlockSpec((cout, m), lambda i: (0, 0)),
        compiler_params=pltpu.CompilerParams(
            dimension_semantics=("arbitrary",)
        ),
        cost_estimate=cost,
    )(w_mat, x_mat, gamma2, beta2)

    # (Cout, M) -> NCHW.  For N=1 this is a pure reshape (free).
    if n == 1:
        return out_mat.reshape(1, cout, h, w)
    return jnp.transpose(out_mat.reshape(cout, n, h, w), (1, 0, 2, 3))


def reference(x_nchw, w_oihw, gamma, beta):
    """Pure-JAX reference matching PyTorch train-mode Conv2d+BatchNorm2d."""
    y = lax.conv_general_dilated(
        x_nchw, w_oihw, window_strides=(1, 1), padding="VALID",
        dimension_numbers=("NCHW", "OIHW", "NCHW"),
    )
    mean = jnp.mean(y, axis=(0, 2, 3), keepdims=True)
    var = jnp.mean((y - mean) ** 2, axis=(0, 2, 3), keepdims=True)
    return (y - mean) / jnp.sqrt(var + EPS) * gamma.reshape(1, -1, 1, 1) + \
        beta.reshape(1, -1, 1, 1)


if __name__ == "__main__":
    key = jax.random.PRNGKey(0)
    k_x, k_w, k_g, k_b = jax.random.split(key, 4)

    N, CIN, H, W = 1, 768, 12, 12   # shapes implied by the module's forward
    COUT = 192

    x = jax.random.normal(k_x, (N, CIN, H, W), dtype=jnp.float32)
    # Deterministic parameter init (synthetic; no checkpoint load).
    conv_w = jax.random.normal(k_w, (COUT, CIN, 1, 1), dtype=jnp.float32) * 0.02
    gamma = jnp.ones((COUT,), dtype=jnp.float32) + 0.1 * jax.random.normal(
        k_g, (COUT,), dtype=jnp.float32
    )
    beta = 0.1 * jax.random.normal(k_b, (COUT,), dtype=jnp.float32)

    out = conv2d_batchnorm(x, conv_w, gamma, beta)
    out = jax.block_until_ready(out)

    ref = jax.block_until_ready(reference(x, conv_w, gamma, beta))
    assert out.shape == (N, COUT, H, W), out.shape
    assert jnp.allclose(out, ref, atol=1e-3, rtol=1e-3), float(
        jnp.max(jnp.abs(out - ref))
    )

    print("KERNEL_OK")
</pallas_src>

<mosaic_0001>
module attributes {stable_mosaic.version = 11 : i64} {
  func.func @conv_bn_kernel(%arg0: i32, %arg1: memref<192x768xf32, #tpu.memory_space<vmem>>, %arg2: memref<768x144xf32, #tpu.memory_space<vmem>>, %arg3: memref<192x1xf32, #tpu.memory_space<vmem>>, %arg4: memref<192x1xf32, #tpu.memory_space<vmem>>, %arg5: memref<192x144xf32, #tpu.memory_space<vmem>>) attributes {dimension_semantics = [#tpu.dimension_semantics<arbitrary>], iteration_bounds = array<i64: 1>, scalar_prefetch = 0 : i64, scratch_operands = 0 : i64, tpu.core_type = #tpu.core_type<tc>, window_params = [{pipeline_mode = #tpu.pipeline_mode<synchronous>, transform_indices = @transform_0, window_bounds = array<i64: 192, 768>}, {pipeline_mode = #tpu.pipeline_mode<synchronous>, transform_indices = @transform_1, window_bounds = array<i64: 768, 144>}, {pipeline_mode = #tpu.pipeline_mode<synchronous>, transform_indices = @transform_2, window_bounds = array<i64: 192, 1>}, {pipeline_mode = #tpu.pipeline_mode<synchronous>, transform_indices = @transform_3, window_bounds = array<i64: 192, 1>}, {pipeline_mode = #tpu.pipeline_mode<synchronous>, transform_indices = @transform_4, window_bounds = array<i64: 192, 144>}]} {
    %c0 = arith.constant 0 : index
    %c0_0 = arith.constant 0 : index
    %0 = vector.load %arg1[%c0, %c0_0] : memref<192x768xf32, #tpu.memory_space<vmem>>, vector<192x768xf32>
    %c0_1 = arith.constant 0 : index
    %c0_2 = arith.constant 0 : index
    %1 = vector.load %arg2[%c0_1, %c0_2] : memref<768x144xf32, #tpu.memory_space<vmem>>, vector<768x144xf32>
    %cst = arith.constant dense<0.000000e+00> : vector<192x144xf32>
    %2 = tpu.matmul %0, %1, %cst {dimension_numbers = #tpu.dot_dimension_numbers<[1], [0], [0], [1], [0, 0, 1, 1], [], []>} : vector<192x768xf32>, vector<768x144xf32>, vector<192x144xf32> -> vector<192x144xf32>
    %cst_3 = arith.constant dense<0.000000e+00> : vector<192xf32>
    %3 = vector.multi_reduction <add>, %2, %cst_3 [1] : vector<192x144xf32> to vector<192xf32>
    %4 = vector.shape_cast %3 : vector<192xf32> to vector<192x1xf32>
    %5 = arith.mulf %2, %2 : vector<192x144xf32>
    %cst_4 = arith.constant dense<0.000000e+00> : vector<192xf32>
    %6 = vector.multi_reduction <add>, %5, %cst_4 [1] : vector<192x144xf32> to vector<192xf32>
    %7 = vector.shape_cast %6 : vector<192xf32> to vector<192x1xf32>
    %cst_5 = arith.constant 0.0069444445 : f32
    %8 = vector.broadcast %cst_5 : f32 to vector<192x1xf32>
    %9 = arith.mulf %4, %8 : vector<192x1xf32>
    %cst_6 = arith.constant 0.0069444445 : f32
    %10 = vector.broadcast %cst_6 : f32 to vector<192x1xf32>
    %11 = arith.mulf %7, %10 : vector<192x1xf32>
    %12 = arith.mulf %9, %9 : vector<192x1xf32>
    %13 = arith.subf %11, %12 : vector<192x1xf32>
    %cst_7 = arith.constant 1.000000e-03 : f32
    %14 = vector.broadcast %cst_7 : f32 to vector<192x1xf32>
    %15 = arith.addf %13, %14 : vector<192x1xf32>
    %16 = math.rsqrt %15 : vector<192x1xf32>
    %c0_8 = arith.constant 0 : index
    %c0_9 = arith.constant 0 : index
    %17 = vector.load %arg3[%c0_8, %c0_9] : memref<192x1xf32, #tpu.memory_space<vmem>>, vector<192x1xf32>
    %18 = arith.mulf %17, %16 : vector<192x1xf32>
    %c0_10 = arith.constant 0 : index
    %c0_11 = arith.constant 0 : index
    %19 = vector.load %arg4[%c0_10, %c0_11] : memref<192x1xf32, #tpu.memory_space<vmem>>, vector<192x1xf32>
    %20 = arith.mulf %9, %18 : vector<192x1xf32>
    %21 = arith.subf %19, %20 : vector<192x1xf32>
    %22 = vector.broadcast %18 : vector<192x1xf32> to vector<192x144xf32>
    %23 = arith.mulf %2, %22 : vector<192x144xf32>
    %24 = vector.broadcast %21 : vector<192x1xf32> to vector<192x144xf32>
    %25 = arith.addf %23, %24 : vector<192x144xf32>
    %c0_12 = arith.constant 0 : index
    %c0_13 = arith.constant 0 : index
    %26 = vector.load %arg5[%c0_12, %c0_13] : memref<192x144xf32, #tpu.memory_space<vmem>>, vector<192x144xf32>
    tpu.vector_store %arg5[%c0_12, %c0_13], %25 {strides = array<i32>} : memref<192x144xf32, #tpu.memory_space<vmem>>, vector<192x144xf32>,
    return
  }
  func.func @transform_0(%arg0: i32) -> (i32, i32) {
    %c0_i32 = arith.constant 0 : i32
    %c0_i32_0 = arith.constant 0 : i32
    %c0_i32_1 = arith.constant 0 : i32
    return %c0_i32, %c0_i32_0 : i32, i32
  }
  func.func @transform_1(%arg0: i32) -> (i32, i32) {
    %c0_i32 = arith.constant 0 : i32
    %c0_i32_0 = arith.constant 0 : i32
    %c0_i32_1 = arith.constant 0 : i32
    return %c0_i32, %c0_i32_0 : i32, i32
  }
  func.func @transform_2(%arg0: i32) -> (i32, i32) {
    %c0_i32 = arith.constant 0 : i32
    %c0_i32_0 = arith.constant 0 : i32
    %c0_i32_1 = arith.constant 0 : i32
    return %c0_i32, %c0_i32_0 : i32, i32
  }
  func.func @transform_3(%arg0: i32) -> (i32, i32) {
    %c0_i32 = arith.constant 0 : i32
    %c0_i32_0 = arith.constant 0 : i32
    %c0_i32_1 = arith.constant 0 : i32
    return %c0_i32, %c0_i32_0 : i32, i32
  }
  func.func @transform_4(%arg0: i32) -> (i32, i32) {
    %c0_i32 = arith.constant 0 : i32
    %c0_i32_0 = arith.constant 0 : i32
    %c0_i32_1 = arith.constant 0 : i32
    return %c0_i32, %c0_i32_0 : i32, i32
  }
}

</mosaic_0001>

<bundles_post_ra>
// kernel: tpu_custom_call.1
= control target key start
LH: loop header
LB: loop body
LE: loop exit
PB: predicated region body
PF: predicated region fallthrough
CT: control target
= control target key end

     0   :  { %vm980_vm0 = vcmask 130048   ;;  %s4184_s1 = inlined_call_operand.vmem [shape: f32[768,144], index: 1, kind: input, shape index: {}]   ;;  %s4185_s0 = inlined_call_operand.vmem [shape: f32[192,768], index: 0, kind: input, shape index: {}]   ;;  %s4186_s2 = inlined_call_operand.vmem [shape: f32[192,1], index: 2, kind: input, shape index: {}]   ;;  %s4187_s3 = inlined_call_operand.vmem [shape: f32[192,1], index: 3, kind: input, shape index: {}]   ;;  %s4188_s4 = inlined_call_operand.vmem [shape: f32[192,144], index: 4, kind: output, shape index: {}]  }
   0x1   :  { %v162_v0 = vld [vmem:[%s4184_s1 + $0x8] sm:$0xff]  ;;  %v164_v1 = vld [vmem:[%s4184_s1 + $0x18] sm:$0xff]  ;;  %v161_v5 = vld [vmem:[%s4184_s1] sm:$0xff] }
   0x2   :  { %v226_v2 = vld [vmem:[%s4184_s1 + $0x208] sm:$0xff]  ;;  %v1873_v3 = vpack.c.bf16 %v164_v1, %v162_v0  ;;  %v228_v4 = vld [vmem:[%s4184_s1 + $0x218] sm:$0xff]  ;;  %v163_v6 = vld [vmem:[%s4184_s1 + $0x10] sm:$0xff] }
   0x3   :  { %v1937_v7 = vpack.c.bf16 %v228_v4, %v226_v2  ;;  %v1875_v8 = vpack.c.bf16 %v163_v6, %v161_v5  ;;  %v225_v9 = vld [vmem:[%s4184_s1 + $0x200] sm:$0xff]  ;;  %v227_v10 = vld [vmem:[%s4184_s1 + $0x210] sm:$0xff]  ;;  %v166_v11 = vld [vmem:[%s4184_s1 + $0x28] sm:$0xff] }
   0x4   :  { %1874 = vmatprep.subr.bf16.mxu1 %v1873_v3  ;;  %v1939_v12 = vpack.c.bf16 %v227_v10, %v225_v9  ;;  %v168_v13 = vld [vmem:[%s4184_s1 + $0x38] sm:$0xff]  ;;  %v230_v14 = vld [vmem:[%s4184_s1 + $0x228] sm:$0xff]  ;;  %v165_v18 = vld [vmem:[%s4184_s1 + $0x20] sm:$0xff] }
   0x5   :  { %v232_v15 = vld [vmem:[%s4184_s1 + $0x238] sm:$0xff]  ;;  %1938 = vmatprep.subr.bf16.mxu0 %v1937_v7  ;;  %1876 = vmatpush1.bf16.msra.mxu1 %v1875_v8  ;;  %v1877_v16 = vpack.c.bf16 %v168_v13, %v166_v11  ;;  %v167_v19 = vld [vmem:[%s4184_s1 + $0x30] sm:$0xff]  ;;  %v229_v20 = vld [vmem:[%s4184_s1 + $0x220] sm:$0xff] }
   0x6   :  { %v1941_v17 = vpack.c.bf16 %v232_v15, %v230_v14  ;;  %1940 = vmatpush1.bf16.msra.mxu0 %v1939_v12  ;;  %v1879_v21 = vpack.c.bf16 %v167_v19, %v165_v18  ;;  %v231_v22 = vld [vmem:[%s4184_s1 + $0x230] sm:$0xff]  ;;  %v170_v23 = vld [vmem:[%s4184_s1 + $0x48] sm:$0xff]  ;;  %v172_v24 = vld [vmem:[%s4184_s1 + $0x58] sm:$0xff] }
   0x7   :  { %1878 = vmatprep.subr.bf16.mxu1 %v1877_v16  ;;  %v1943_v25 = vpack.c.bf16 %v231_v22, %v229_v20  ;;  %v1881_v26 = vpack.c.bf16 %v172_v24, %v170_v23  ;;  %v234_v27 = vld [vmem:[%s4184_s1 + $0x248] sm:$0xff]  ;;  %v236_v28 = vld [vmem:[%s4184_s1 + $0x258] sm:$0xff]  ;;  %v169_v29 = vld [vmem:[%s4184_s1 + $0x40] sm:$0xff] }
   0x8   :  { %1942 = vmatprep.subr.bf16.mxu0 %v1941_v17  ;;  %v1945_v30 = vpack.c.bf16 %v236_v28, %v234_v27  ;;  %v171_v31 = vld [vmem:[%s4184_s1 + $0x50] sm:$0xff]  ;;  %v233_v32 = vld [vmem:[%s4184_s1 + $0x240] sm:$0xff]  ;;  %v174_v35 = vld [vmem:[%s4184_s1 + $0x68] sm:$0xff] }
   0x9   :  { %v235_v33 = vld [vmem:[%s4184_s1 + $0x250] sm:$0xff]  ;;  %1880 = vmatpush1.bf16.msra.mxu1 %v1879_v21  ;;  %v1883_v34 = vpack.c.bf16 %v171_v31, %v169_v29  ;;  %v176_v36 = vld [vmem:[%s4184_s1 + $0x78] sm:$0xff]  ;;  %v238_v37 = vld [vmem:[%s4184_s1 + $0x268] sm:$0xff] }
   0xa   :  { %1944 = vmatpush1.bf16.msra.mxu0 %v1943_v25  ;;  %1882 = vmatprep.subr.bf16.mxu1 %v1881_v26  ;;  %v1947_v38 = vpack.c.bf16 %v235_v33, %v233_v32  ;;  %v1885_v39 = vpack.c.bf16 %v176_v36, %v174_v35  ;;  %v240_v40 = vld [vmem:[%s4184_s1 + $0x278] sm:$0xff]  ;;  %v173_v41 = vld [vmem:[%s4184_s1 + $0x60] sm:$0xff]  ;;  %v175_v42 = vld [vmem:[%s4184_s1 + $0x70] sm:$0xff] }
   0xb   :  { %1946 = vmatprep.subr.bf16.mxu0 %v1945_v30  ;;  %v1949_v43 = vpack.c.bf16 %v240_v40, %v238_v37  ;;  %v237_v44 = vld [vmem:[%s4184_s1 + $0x260] sm:$0xff]  ;;  %v239_v45 = vld [vmem:[%s4184_s1 + $0x270] sm:$0xff]  ;;  %v178_v46 = vld [vmem:[%s4184_s1 + $0x88] sm:$0xff]  ;;  %v1887_v50 = vpack.c.bf16 %v175_v42, %v173_v41 }
   0xc   :  { %v180_v47 = vld [vmem:[%s4184_s1 + $0x98] sm:$0xff]  ;;  %v242_v48 = vld [vmem:[%s4184_s1 + $0x288] sm:$0xff]  ;;  %v1951_v51 = vpack.c.bf16 %v239_v45, %v237_v44  ;;  %v177_v53 = vld [vmem:[%s4184_s1 + $0x80] sm:$0xff] }
   0xd   :  { %v244_v49 = vld [vmem:[%s4184_s1 + $0x298] sm:$0xff]  ;;  %1884 = vmatpush1.bf16.msra.mxu1 %v1883_v34  ;;  %v1889_v52 = vpack.c.bf16 %v180_v47, %v178_v46  ;;  %v179_v54 = vld [vmem:[%s4184_s1 + $0x90] sm:$0xff]  ;;  %v241_v55 = vld [vmem:[%s4184_s1 + $0x280] sm:$0xff] }
   0xe   :  { %1948 = vmatpush1.bf16.msra.mxu0 %v1947_v38  ;;  %1886 = vmatprep.subr.bf16.mxu1 %v1885_v39  ;;  %v1953_v56 = vpack.c.bf16 %v244_v49, %v242_v48  ;;  %v243_v57 = vld [vmem:[%s4184_s1 + $0x290] sm:$0xff]  ;;  %v182_v58 = vld [vmem:[%s4184_s1 + $0xa8] sm:$0xff]  ;;  %v184_v59 = vld [vmem:[%s4184_s1 + $0xb8] sm:$0xff]  ;;  %v1891_v62 = vpack.c.bf16 %v179_v54, %v177_v53 }
   0xf   :  { %1950 = vmatprep.subr.bf16.mxu0 %v1949_v43  ;;  %v246_v60 = vld [vmem:[%s4184_s1 + $0x2a8] sm:$0xff]  ;;  %v248_v61 = vld [vmem:[%s4184_s1 + $0x2b8] sm:$0xff]  ;;  %v1955_v63 = vpack.c.bf16 %v243_v57, %v241_v55  ;;  %v1893_v0 = vpack.c.bf16 %v184_v59, %v182_v58  ;;  %v181_v1 = vld [vmem:[%s4184_s1 + $0xa0] sm:$0xff] }
  0x10   :  { %v183_v2 = vld [vmem:[%s4184_s1 + $0xb0] sm:$0xff]  ;;  %v245_v3 = vld [vmem:[%s4184_s1 + $0x2a0] sm:$0xff]  ;;  %v1957_v4 = vpack.c.bf16 %v248_v61, %v246_v60  ;;  %v186_v6 = vld [vmem:[%s4184_s1 + $0xc8] sm:$0xff] }
  0x11   :  { %1888 = vmatpush1.bf16.msra.mxu1 %v1887_v50  ;;  %v247_v5 = vld [vmem:[%s4184_s1 + $0x2b0] sm:$0xff]  ;;  %v188_v7 = vld [vmem:[%s4184_s1 + $0xd8] sm:$0xff]  ;;  %v250_v8 = vld [vmem:[%s4184_s1 + $0x2c8] sm:$0xff]  ;;  %v1895_v10 = vpack.c.bf16 %v183_v2, %v181_v1 }
  0x12   :  { %1952 = vmatpush1.bf16.msra.mxu0 %v1951_v51  ;;  %1890 = vmatprep.subr.bf16.mxu1 %v1889_v52  ;;  %v252_v9 = vld [vmem:[%s4184_s1 + $0x2d8] sm:$0xff]  ;;  %v1959_v11 = vpack.c.bf16 %v247_v5, %v245_v3  ;;  %v1897_v12 = vpack.c.bf16 %v188_v7, %v186_v6  ;;  %v185_v13 = vld [vmem:[%s4184_s1 + $0xc0] sm:$0xff]  ;;  %v187_v14 = vld [vmem:[%s4184_s1 + $0xd0] sm:$0xff] }
  0x13   :  { %1954 = vmatprep.subr.bf16.mxu0 %v1953_v56  ;;  %v249_v15 = vld [vmem:[%s4184_s1 + $0x2c0] sm:$0xff]  ;;  %v1961_v16 = vpack.c.bf16 %v252_v9, %v250_v8  ;;  %v251_v17 = vld [vmem:[%s4184_s1 + $0x2d0] sm:$0xff]  ;;  %v190_v18 = vld [vmem:[%s4184_s1 + $0xe8] sm:$0xff]  ;;  %v1899_v22 = vpack.c.bf16 %v187_v14, %v185_v13 }
  0x14   :  { %v192_v19 = vld [vmem:[%s4184_s1 + $0xf8] sm:$0xff]  ;;  %v254_v20 = vld [vmem:[%s4184_s1 + $0x2e8] sm:$0xff]  ;;  %v1963_v23 = vpack.c.bf16 %v251_v17, %v249_v15  ;;  %v189_v25 = vld [vmem:[%s4184_s1 + $0xe0] sm:$0xff] }
  0x15   :  { %1892 = vmatpush1.bf16.msra.mxu1 %v1891_v62  ;;  %v256_v21 = vld [vmem:[%s4184_s1 + $0x2f8] sm:$0xff]  ;;  %v1901_v24 = vpack.c.bf16 %v192_v19, %v190_v18  ;;  %v191_v26 = vld [vmem:[%s4184_s1 + $0xf0] sm:$0xff]  ;;  %v253_v27 = vld [vmem:[%s4184_s1 + $0x2e0] sm:$0xff] }
  0x16   :  { %1956 = vmatpush1.bf16.msra.mxu0 %v1955_v63  ;;  %1894 = vmatprep.subr.bf16.mxu1 %v1893_v0  ;;  %v1965_v28 = vpack.c.bf16 %v256_v21, %v254_v20  ;;  %v255_v29 = vld [vmem:[%s4184_s1 + $0x2f0] sm:$0xff]  ;;  %v194_v30 = vld [vmem:[%s4184_s1 + $0x108] sm:$0xff]  ;;  %v196_v31 = vld [vmem:[%s4184_s1 + $0x118] sm:$0xff]  ;;  %v1903_v34 = vpack.c.bf16 %v191_v26, %v189_v25 }
  0x17   :  { %1958 = vmatprep.subr.bf16.mxu0 %v1957_v4  ;;  %v258_v32 = vld [vmem:[%s4184_s1 + $0x308] sm:$0xff]  ;;  %v260_v33 = vld [vmem:[%s4184_s1 + $0x318] sm:$0xff]  ;;  %v1967_v35 = vpack.c.bf16 %v255_v29, %v253_v27  ;;  %v1905_v36 = vpack.c.bf16 %v196_v31, %v194_v30  ;;  %v193_v37 = vld [vmem:[%s4184_s1 + $0x100] sm:$0xff] }
  0x18   :  { %v195_v38 = vld [vmem:[%s4184_s1 + $0x110] sm:$0xff]  ;;  %v257_v39 = vld [vmem:[%s4184_s1 + $0x300] sm:$0xff]  ;;  %v1969_v40 = vpack.c.bf16 %v260_v33, %v258_v32  ;;  %v198_v42 = vld [vmem:[%s4184_s1 + $0x128] sm:$0xff] }
  0x19   :  { %1896 = vmatpush1.bf16.msra.mxu1 %v1895_v10  ;;  %v259_v41 = vld [vmem:[%s4184_s1 + $0x310] sm:$0xff]  ;;  %v200_v43 = vld [vmem:[%s4184_s1 + $0x138] sm:$0xff]  ;;  %v262_v44 = vld [vmem:[%s4184_s1 + $0x328] sm:$0xff]  ;;  %v1907_v46 = vpack.c.bf16 %v195_v38, %v193_v37 }
  0x1a   :  { %1960 = vmatpush1.bf16.msra.mxu0 %v1959_v11  ;;  %1898 = vmatprep.subr.bf16.mxu1 %v1897_v12  ;;  %v264_v45 = vld [vmem:[%s4184_s1 + $0x338] sm:$0xff]  ;;  %v1971_v47 = vpack.c.bf16 %v259_v41, %v257_v39  ;;  %v1909_v48 = vpack.c.bf16 %v200_v43, %v198_v42  ;;  %v197_v49 = vld [vmem:[%s4184_s1 + $0x120] sm:$0xff]  ;;  %v199_v50 = vld [vmem:[%s4184_s1 + $0x130] sm:$0xff] }
  0x1b   :  { %1962 = vmatprep.subr.bf16.mxu0 %v1961_v16  ;;  %v261_v51 = vld [vmem:[%s4184_s1 + $0x320] sm:$0xff]  ;;  %v1973_v52 = vpack.c.bf16 %v264_v45, %v262_v44  ;;  %v263_v53 = vld [vmem:[%s4184_s1 + $0x330] sm:$0xff]  ;;  %v202_v54 = vld [vmem:[%s4184_s1 + $0x148] sm:$0xff]  ;;  %v1911_v58 = vpack.c.bf16 %v199_v50, %v197_v49 }
  0x1c   :  { %v204_v55 = vld [vmem:[%s4184_s1 + $0x158] sm:$0xff]  ;;  %v266_v56 = vld [vmem:[%s4184_s1 + $0x348] sm:$0xff]  ;;  %v1975_v59 = vpack.c.bf16 %v263_v53, %v261_v51  ;;  %v201_v61 = vld [vmem:[%s4184_s1 + $0x140] sm:$0xff] }
  0x1d   :  { %1900 = vmatpush1.bf16.msra.mxu1 %v1899_v22  ;;  %v268_v57 = vld [vmem:[%s4184_s1 + $0x358] sm:$0xff]  ;;  %v1913_v60 = vpack.c.bf16 %v204_v55, %v202_v54  ;;  %v203_v62 = vld [vmem:[%s4184_s1 + $0x150] sm:$0xff]  ;;  %v265_v63 = vld [vmem:[%s4184_s1 + $0x340] sm:$0xff] }
  0x1e   :  { %1964 = vmatpush1.bf16.msra.mxu0 %v1963_v23  ;;  %1902 = vmatprep.subr.bf16.mxu1 %v1901_v24  ;;  %v1977_v0 = vpack.c.bf16 %v268_v57, %v266_v56  ;;  %v267_v1 = vld [vmem:[%s4184_s1 + $0x350] sm:$0xff]  ;;  %v206_v2 = vld [vmem:[%s4184_s1 + $0x168] sm:$0xff]  ;;  %v208_v3 = vld [vmem:[%s4184_s1 + $0x178] sm:$0xff]  ;;  %v1915_v6 = vpack.c.bf16 %v203_v62, %v201_v61 }
  0x1f   :  { %1966 = vmatprep.subr.bf16.mxu0 %v1965_v28  ;;  %v270_v4 = vld [vmem:[%s4184_s1 + $0x368] sm:$0xff]  ;;  %v272_v5 = vld [vmem:[%s4184_s1 + $0x378] sm:$0xff]  ;;  %v205_v7 = vld [vmem:[%s4184_s1 + $0x160] sm:$0xff]  ;;  %v1979_v8 = vpack.c.bf16 %v267_v1, %v265_v63  ;;  %v1917_v9 = vpack.c.bf16 %v208_v3, %v206_v2 }
  0x20   :  { %v207_v10 = vld [vmem:[%s4184_s1 + $0x170] sm:$0xff]  ;;  %v269_v11 = vld [vmem:[%s4184_s1 + $0x360] sm:$0xff]  ;;  %v1981_v13 = vpack.c.bf16 %v272_v5, %v270_v4  ;;  %v210_v14 = vld [vmem:[%s4184_s1 + $0x188] sm:$0xff] }
  0x21   :  { %1904 = vmatpush1.bf16.msra.mxu1 %v1903_v34  ;;  %v271_v12 = vld [vmem:[%s4184_s1 + $0x370] sm:$0xff]  ;;  %v212_v15 = vld [vmem:[%s4184_s1 + $0x198] sm:$0xff]  ;;  %v18_v16 = vld [vmem:[%s4185_s0 + $0x8] sm:$0xff]  ;;  %v1919_v20 = vpack.c.bf16 %v207_v10, %v205_v7 }
  0x22   :  { %1968 = vmatpush1.bf16.msra.mxu0 %v1967_v35  ;;  %1906 = vmatprep.subr.bf16.mxu1 %v1905_v36  ;;  %v274_v17 = vld [vmem:[%s4184_s1 + $0x388] sm:$0xff]  ;;  %v276_v18 = vld [vmem:[%s4184_s1 + $0x398] sm:$0xff]  ;;  %v1983_v21 = vpack.c.bf16 %v271_v12, %v269_v11  ;;  %v1921_v22 = vpack.c.bf16 %v212_v15, %v210_v14  ;;  %v209_v23 = vld [vmem:[%s4184_s1 + $0x180] sm:$0xff] }
  0x23   :  { %1970 = vmatprep.subr.bf16.mxu0 %v1969_v40  ;;  %417 = vmatprep.mubr.f32.mxu1 %v18_v16  ;;  %v20_v19 = vld [vmem:[%s4185_s0 + $0x18] sm:$0xff]  ;;  %v211_v24 = vld [vmem:[%s4184_s1 + $0x190] sm:$0xff]  ;;  %v273_v25 = vld [vmem:[%s4184_s1 + $0x380] sm:$0xff]  ;;  %v1985_v26 = vpack.c.bf16 %v276_v18, %v274_v17 }
  0x24   :  { %626 = vmatprep.mubr.f32.mxu0 %v20_v19  ;;  %v275_v27 = vld [vmem:[%s4184_s1 + $0x390] sm:$0xff]  ;;  %v214_v28 = vld [vmem:[%s4184_s1 + $0x1a8] sm:$0xff]  ;;  %v216_v29 = vld [vmem:[%s4184_s1 + $0x1b8] sm:$0xff]  ;;  %v1923_v32 = vpack.c.bf16 %v211_v24, %v209_v23 }
  0x25   :  { %1908 = vmatpush1.bf16.msra.mxu1 %v1907_v46  ;;  %v278_v30 = vld [vmem:[%s4184_s1 + $0x3a8] sm:$0xff]  ;;  %v280_v31 = vld [vmem:[%s4184_s1 + $0x3b8] sm:$0xff]  ;;  %v1987_v33 = vpack.c.bf16 %v275_v27, %v273_v25  ;;  %v1925_v34 = vpack.c.bf16 %v216_v29, %v214_v28  ;;  %v213_v35 = vld [vmem:[%s4184_s1 + $0x1a0] sm:$0xff] }
  0x26   :  { %1972 = vmatpush1.bf16.msra.mxu0 %v1971_v47  ;;  %1910 = vmatprep.subr.bf16.mxu1 %v1909_v48  ;;  %v215_v36 = vld [vmem:[%s4184_s1 + $0x1b0] sm:$0xff]  ;;  %v277_v37 = vld [vmem:[%s4184_s1 + $0x3a0] sm:$0xff]  ;;  %v1989_v38 = vpack.c.bf16 %v280_v31, %v278_v30  ;;  %v218_v40 = vld [vmem:[%s4184_s1 + $0x1c8] sm:$0xff] }
  0x27   :  { %1974 = vmatprep.subr.bf16.mxu0 %v1973_v52  ;;  %v279_v39 = vld [vmem:[%s4184_s1 + $0x3b0] sm:$0xff]  ;;  %v220_v41 = vld [vmem:[%s4184_s1 + $0x1d8] sm:$0xff]  ;;  %v282_v42 = vld [vmem:[%s4184_s1 + $0x3c8] sm:$0xff]  ;;  %v1927_v44 = vpack.c.bf16 %v215_v36, %v213_v35 }
  0x28   :  { %v284_v43 = vld [vmem:[%s4184_s1 + $0x3d8] sm:$0xff]  ;;  %v1991_v45 = vpack.c.bf16 %v279_v39, %v277_v37  ;;  %v1929_v46 = vpack.c.bf16 %v220_v41, %v218_v40  ;;  %v217_v47 = vld [vmem:[%s4184_s1 + $0x1c0] sm:$0xff]  ;;  %v219_v48 = vld [vmem:[%s4184_s1 + $0x1d0] sm:$0xff] }
  0x29   :  { %1912 = vmatpush1.bf16.msra.mxu1 %v1911_v58  ;;  %v281_v49 = vld [vmem:[%s4184_s1 + $0x3c0] sm:$0xff]  ;;  %v1993_v50 = vpack.c.bf16 %v284_v43, %v282_v42  ;;  %v283_v51 = vld [vmem:[%s4184_s1 + $0x3d0] sm:$0xff]  ;;  %v222_v52 = vld [vmem:[%s4184_s1 + $0x1e8] sm:$0xff]  ;;  %v1931_v56 = vpack.c.bf16 %v219_v48, %v217_v47 }
  0x2a   :  { %1976 = vmatpush1.bf16.msra.mxu0 %v1975_v59  ;;  %1914 = vmatprep.subr.bf16.mxu1 %v1913_v60  ;;  %v224_v53 = vld [vmem:[%s4184_s1 + $0x1f8] sm:$0xff]  ;;  %v286_v54 = vld [vmem:[%s4184_s1 + $0x3e8] sm:$0xff]  ;;  %v1995_v57 = vpack.c.bf16 %v283_v51, %v281_v49  ;;  %v221_v59 = vld [vmem:[%s4184_s1 + $0x1e0] sm:$0xff] }
  0x2b   :  { %1978 = vmatprep.subr.bf16.mxu0 %v1977_v0  ;;  %v288_v55 = vld [vmem:[%s4184_s1 + $0x3f8] sm:$0xff]  ;;  %v1933_v58 = vpack.c.bf16 %v224_v53, %v222_v52  ;;  %v223_v60 = vld [vmem:[%s4184_s1 + $0x1f0] sm:$0xff]  ;;  %v285_v61 = vld [vmem:[%s4184_s1 + $0x3e0] sm:$0xff] }
  0x2c   :  { %v1997_v62 = vpack.c.bf16 %v288_v55, %v286_v54  ;;  %v287_v63 = vld [vmem:[%s4184_s1 + $0x3f0] sm:$0xff]  ;;  %v290_v0 = vld [vmem:[%s4184_s1 + $0x408] sm:$0xff]  ;;  %v292_v1 = vld [vmem:[%s4184_s1 + $0x418] sm:$0xff]  ;;  %v1935_v2 = vpack.c.bf16 %v223_v60, %v221_v59 }
  0x2d   :  { %1916 = vmatpush1.bf16.msra.mxu1 %v1915_v6  ;;  %v1999_v3 = vpack.c.bf16 %v287_v63, %v285_v61  ;;  %v2001_v4 = vpack.c.bf16 %v292_v1, %v290_v0  ;;  %v289_v5 = vld [vmem:[%s4184_s1 + $0x400] sm:$0xff]  ;;  %v291_v6 = vld [vmem:[%s4184_s1 + $0x410] sm:$0xff]  ;;  %v294_v7 = vld [vmem:[%s4184_s1 + $0x428] sm:$0xff] }
  0x2e   :  { %1980 = vmatpush1.bf16.msra.mxu0 %v1979_v8  ;;  %1918 = vmatprep.subr.bf16.mxu1 %v1917_v9  ;;  %v296_v8 = vld [vmem:[%s4184_s1 + $0x438] sm:$0xff]  ;;  %v17_v9 = vld [vmem:[%s4185_s0] sm:$0xff]  ;;  %v19_v10 = vld [vmem:[%s4185_s0 + $0x10] sm:$0xff]  ;;  %v2003_v11 = vpack.c.bf16 %v291_v6, %v289_v5 }
  0x2f   :  { %1982 = vmatprep.subr.bf16.mxu0 %v1981_v13  ;;  %v24_v12 = vld [vmem:[%s4185_s0 + $0x38] sm:$0xff]  ;;  %v26_v13 = vld [vmem:[%s4185_s0 + $0x48] sm:$0xff]  ;;  %v2005_v14 = vpack.c.bf16 %v296_v8, %v294_v7  ;;  %v293_v15 = vld [vmem:[%s4184_s1 + $0x420] sm:$0xff] }
  0x30   :  { %v295_v16 = vld [vmem:[%s4184_s1 + $0x430] sm:$0xff]  ;;  %v298_v17 = vld [vmem:[%s4184_s1 + $0x448] sm:$0xff]  ;;  %v300_v18 = vld [vmem:[%s4184_s1 + $0x458] sm:$0xff] }
  0x31   :  { %1920 = vmatpush1.bf16.msra.mxu1 %v1919_v20  ;;  %v23_v19 = vld [vmem:[%s4185_s0 + $0x30] sm:$0xff]  ;;  %v25_v20 = vld [vmem:[%s4185_s0 + $0x40] sm:$0xff]  ;;  %v32_v23 = vld [vmem:[%s4185_s0 + $0x78] sm:$0xff]  ;;  %v2009_v24 = vpack.c.bf16 %v300_v18, %v298_v17 }
  0x32   :  { %1984 = vmatpush1.bf16.msra.mxu0 %v1983_v21  ;;  %1922 = vmatprep.subr.bf16.mxu1 %v1921_v22  ;;  %v30_v21 = vld [vmem:[%s4185_s0 + $0x68] sm:$0xff]  ;;  %v2007_v22 = vpack.c.bf16 %v295_v16, %v293_v15  ;;  %v297_v25 = vld [vmem:[%s4184_s1 + $0x440] sm:$0xff]  ;;  %v304_v28 = vld [vmem:[%s4184_s1 + $0x478] sm:$0xff] }
  0x33   :  { %1986 = vmatprep.subr.bf16.mxu0 %v1985_v26  ;;  %v299_v26 = vld [vmem:[%s4184_s1 + $0x450] sm:$0xff]  ;;  %v302_v27 = vld [vmem:[%s4184_s1 + $0x468] sm:$0xff]  ;;  %v29_v29 = vld [vmem:[%s4185_s0 + $0x60] sm:$0xff] }
  0x34   :  { %v31_v30 = vld [vmem:[%s4185_s0 + $0x70] sm:$0xff]  ;;  %v36_v31 = vld [vmem:[%s4185_s0 + $0x98] sm:$0xff]  ;;  %v301_v35 = vld [vmem:[%s4184_s1 + $0x460] sm:$0xff] }
  0x35   :  { %1924 = vmatpush1.bf16.msra.mxu1 %v1923_v32  ;;  %v2011_v32 = vpack.c.bf16 %v299_v26, %v297_v25  ;;  %v303_v36 = vld [vmem:[%s4184_s1 + $0x470] sm:$0xff]  ;;  %v306_v37 = vld [vmem:[%s4184_s1 + $0x488] sm:$0xff]  ;;  %v37_v40 = vld [vmem:[%s4185_s0 + $0xa0] sm:$0xff] }
  0x36   :  { %1988 = vmatpush1.bf16.msra.mxu0 %v1987_v33  ;;  %1926 = vmatprep.subr.bf16.mxu1 %v1925_v34  ;;  %v38_v33 = vld [vmem:[%s4185_s0 + $0xa8] sm:$0xff]  ;;  %v2013_v34 = vpack.c.bf16 %v304_v28, %v302_v27  ;;  %v35_v39 = vld [vmem:[%s4185_s0 + $0x90] sm:$0xff]  ;;  %v2015_v42 = vpack.c.bf16 %v303_v36, %v301_v35  ;;  %v44_v43 = vld [vmem:[%s4185_s0 + $0xd8] sm:$0xff] }
  0x37   :  { %1990 = vmatprep.subr.bf16.mxu0 %v1989_v38  ;;  %v308_v38 = vld [vmem:[%s4184_s1 + $0x498] sm:$0xff]  ;;  %v42_v41 = vld [vmem:[%s4185_s0 + $0xc8] sm:$0xff]  ;;  %v41_v49 = vld [vmem:[%s4185_s0 + $0xc0] sm:$0xff] }
  0x38   :  { %v310_v47 = vld [vmem:[%s4184_s1 + $0x4a8] sm:$0xff]  ;;  %v312_v48 = vld [vmem:[%s4184_s1 + $0x4b8] sm:$0xff]  ;;  %v309_v55 = vld [vmem:[%s4184_s1 + $0x4a0] sm:$0xff] }
  0x39   :  { %1928 = vmatpush1.bf16.msra.mxu1 %v1927_v44  ;;  %v2017_v44 = vpack.c.bf16 %v308_v38, %v306_v37  ;;  %v48_v51 = vld [vmem:[%s4185_s0 + $0xf8] sm:$0xff]  ;;  %v50_v53 = vld [vmem:[%s4185_s0 + $0x108] sm:$0xff]  ;;  %v2021_v54 = vpack.c.bf16 %v312_v48, %v310_v47  ;;  %v47_v59 = vld [vmem:[%s4185_s0 + $0xf0] sm:$0xff] }
  0x3a   :  { %1992 = vmatpush1.bf16.msra.mxu0 %v1991_v45  ;;  %1930 = vmatprep.subr.bf16.mxu1 %v1929_v46  ;;  %v305_v45 = vld [vmem:[%s4184_s1 + $0x480] sm:$0xff]  ;;  %v307_v46 = vld [vmem:[%s4184_s1 + $0x490] sm:$0xff]  ;;  %v54_v61 = vld [vmem:[%s4185_s0 + $0x128] sm:$0xff] }
  0x3b   :  { %1994 = vmatprep.subr.bf16.mxu0 %v1993_v50  ;;  %v43_v50 = vld [vmem:[%s4185_s0 + $0xd0] sm:$0xff]  ;;  %v2019_v52 = vpack.c.bf16 %v307_v46, %v305_v45  ;;  %v49_v60 = vld [vmem:[%s4185_s0 + $0x100] sm:$0xff]  ;;  %v56_v63 = vld [vmem:[%s4185_s0 + $0x138] sm:$0xff] }
  0x3c   :  { %v313_v1 = vld [vmem:[%s4184_s1 + $0x4c0] sm:$0xff]  ;;  %v55_v6 = vld [vmem:[%s4185_s0 + $0x130] sm:$0xff]  ;;  %v60_v7 = vld [vmem:[%s4185_s0 + $0x158] sm:$0xff] }
  0x3d   :  { %1932 = vmatpush1.bf16.msra.mxu1 %v1931_v56  ;;  %v311_v56 = vld [vmem:[%s4184_s1 + $0x4b0] sm:$0xff]  ;;  %v53_v5 = vld [vmem:[%s4185_s0 + $0x120] sm:$0xff]  ;;  %v66_v17 = vld [vmem:[%s4185_s0 + $0x188] sm:$0xff] }
  0x3e   :  { %1996 = vmatpush1.bf16.msra.mxu0 %v1995_v57  ;;  %1934 = vmatprep.subr.bf16.mxu1 %v1933_v58  ;;  %v314_v57 = vld [vmem:[%s4184_s1 + $0x4c8] sm:$0xff]  ;;  %v316_v58 = vld [vmem:[%s4184_s1 + $0x4d8] sm:$0xff]  ;;  %v59_v15 = vld [vmem:[%s4185_s0 + $0x150] sm:$0xff] }
  0x3f   :  { %1998 = vmatprep.subr.bf16.mxu0 %v1997_v62  ;;  %v2023_v62 = vpack.c.bf16 %v311_v56, %v309_v55  ;;  %v2025_v0 = vpack.c.bf16 %v316_v58, %v314_v57  ;;  %v61_v16 = vld [vmem:[%s4185_s0 + $0x160] sm:$0xff]  ;;  %v67_v26 = vld [vmem:[%s4185_s0 + $0x190] sm:$0xff]  ;;  %v72_v27 = vld [vmem:[%s4185_s0 + $0x1b8] sm:$0xff] }
  0x40   :  { %v65_v25 = vld [vmem:[%s4185_s0 + $0x180] sm:$0xff]  ;;  %v71_v35 = vld [vmem:[%s4185_s0 + $0x1b0] sm:$0xff]  ;;  %v78_v37 = vld [vmem:[%s4185_s0 + $0x1e8] sm:$0xff] }
  0x41   :  { %1936 = vmatpush1.bf16.msra.mxu1 %v1935_v2  ;;  %v315_v2 = vld [vmem:[%s4184_s1 + $0x4d0] sm:$0xff]  ;;  %v73_v36 = vld [vmem:[%s4185_s0 + $0x1c0] sm:$0xff]  ;;  %v84_v47 = vld [vmem:[%s4185_s0 + $0x218] sm:$0xff] }
  0x42   :  { %2000 = vmatpush1.bf16.msra.mxu0 %v1999_v3  ;;  %2065 = vmatprep.subr.bf16.mxu1 %v2001_v4  ;;  %v318_v3 = vld [vmem:[%s4184_s1 + $0x4e8] sm:$0xff]  ;;  %v2027_v8 = vpack.c.bf16 %v315_v2, %v313_v1  ;;  %v77_v45 = vld [vmem:[%s4185_s0 + $0x1e0] sm:$0xff]  ;;  %v79_v46 = vld [vmem:[%s4185_s0 + $0x1f0] sm:$0xff] }
  0x43   :  { %2002 = vmatprep.subr.bf16.mxu0 %v2001_v4  ;;  %v320_v4 = vld [vmem:[%s4184_s1 + $0x4f8] sm:$0xff]  ;;  %v83_v55 = vld [vmem:[%s4185_s0 + $0x210] sm:$0xff]  ;;  %v85_v56 = vld [vmem:[%s4185_s0 + $0x220] sm:$0xff] }
  0x44   :  { %418 = vmatmul.mubr.f32.vlgmr.msra.gmra.mrb[0].mxu1 %v17_v9  ;;  %v62_v9 = vld [vmem:[%s4185_s0 + $0x168] sm:$0xff]  ;;  %v89_v1 = vld [vmem:[%s4185_s0 + $0x240] sm:$0xff]  ;;  %v91_v2 = vld [vmem:[%s4185_s0 + $0x250] sm:$0xff] }
  0x45   :  { %627 = vmatmul.mubr.f32.vlgmr.msra.gmra.mrb[0].mxu0 %v19_v10  ;;  %423 = vmatprep.mubr.f32.mxu1 %v24_v12  ;;  %v2029_v10 = vpack.c.bf16 %v320_v4, %v318_v3  ;;  %v319_v12 = vld [vmem:[%s4184_s1 + $0x4f0] sm:$0xff]  ;;  %v90_v57 = vld [vmem:[%s4185_s0 + $0x248] sm:$0xff]  ;;  %v96_v3 = vld [vmem:[%s4185_s0 + $0x278] sm:$0xff] }
  0x46   :  { %2004 = vmatpush1.bf16.msra.mxu0 %v2003_v11  ;;  %632 = vmatprep.mubr.f32.mxu0 %v26_v13  ;;  %v322_v13 = vld [vmem:[%s4184_s1 + $0x508] sm:$0xff] }
  0x47   :  { %2081 = vmatpush1.bf16.msra.mxu1 %v2003_v11  ;;  %2006 = vmatprep.subr.bf16.mxu0 %v2005_v14  ;;  %v317_v11 = vld [vmem:[%s4184_s1 + $0x4e0] sm:$0xff] }
  0x48   :  { %424 = vmatmul.mubr.f32.gmra.mrb[2].mxu1 %v23_v19  ;;  %2066 = vmatprep.subr.bf16.mxu1 %v2005_v14  ;;  %v324_v14 = vld [vmem:[%s4184_s1 + $0x518] sm:$0xff]  ;;  %v2031_v18 = vpack.c.bf16 %v319_v12, %v317_v11  ;;  %v95_v11 = vld [vmem:[%s4185_s0 + $0x270] sm:$0xff]  ;;  %v97_v12 = vld [vmem:[%s4185_s0 + $0x280] sm:$0xff] }
  0x49   :  { %633 = vmatmul.mubr.f32.gmra.mrb[2].mxu0 %v25_v20  ;;  %429 = vmatprep.mubr.f32.mxu1 %v30_v21  ;;  %v68_v19 = vld [vmem:[%s4185_s0 + $0x198] sm:$0xff]  ;;  %v2033_v20 = vpack.c.bf16 %v324_v14, %v322_v13  ;;  %v321_v21 = vld [vmem:[%s4184_s1 + $0x500] sm:$0xff]  ;;  %v102_v13 = vld [vmem:[%s4185_s0 + $0x2a8] sm:$0xff] }
  0x4a   :  { %638 = vmatprep.mubr.f32.mxu0 %v32_v23  ;;  %2008 = vmatpush1.bf16.msra.mxu0 %v2007_v22  ;;  %v326_v23 = vld [vmem:[%s4184_s1 + $0x528] sm:$0xff] }
  0x4b   :  { %2082 = vmatpush1.bf16.msra.mxu1 %v2007_v22  ;;  %2010 = vmatprep.subr.bf16.mxu0 %v2009_v24  ;;  %v323_v22 = vld [vmem:[%s4184_s1 + $0x510] sm:$0xff] }
  0x4c   :  { %430 = vmatmul.mubr.f32.gmra.mrb[4].mxu1 %v29_v29  ;;  %2067 = vmatprep.subr.bf16.mxu1 %v2009_v24  ;;  %v328_v24 = vld [vmem:[%s4184_s1 + $0x538] sm:$0xff]  ;;  %v2035_v28 = vpack.c.bf16 %v323_v22, %v321_v21  ;;  %v74_v29 = vld [vmem:[%s4185_s0 + $0x1c8] sm:$0xff]  ;;  %v101_v21 = vld [vmem:[%s4185_s0 + $0x2a0] sm:$0xff] }
  0x4d   :  { %639 = vmatmul.mubr.f32.gmra.mrb[4].mxu0 %v31_v30  ;;  %435 = vmatprep.mubr.f32.mxu1 %v36_v31  ;;  %v2037_v30 = vpack.c.bf16 %v328_v24, %v326_v23  ;;  %v325_v31 = vld [vmem:[%s4184_s1 + $0x520] sm:$0xff]  ;;  %v103_v22 = vld [vmem:[%s4185_s0 + $0x2b0] sm:$0xff]  ;;  %v108_v23 = vld [vmem:[%s4185_s0 + $0x2d8] sm:$0xff] }
  0x4e   :  { %644 = vmatprep.mubr.f32.mxu0 %v38_v33  ;;  %2012 = vmatpush1.bf16.msra.mxu0 %v2011_v32  ;;  %v330_v33 = vld [vmem:[%s4184_s1 + $0x548] sm:$0xff] }
  0x4f   :  { %2083 = vmatpush1.bf16.msra.mxu1 %v2011_v32  ;;  %2014 = vmatprep.subr.bf16.mxu0 %v2013_v34  ;;  %v327_v32 = vld [vmem:[%s4184_s1 + $0x530] sm:$0xff] }
  0x50   :  { %436 = vmatmul.mubr.f32.gmra.mrb[6].mxu1 %v35_v39  ;;  %2068 = vmatprep.subr.bf16.mxu1 %v2013_v34  ;;  %v332_v34 = vld [vmem:[%s4184_s1 + $0x558] sm:$0xff]  ;;  %v2039_v38 = vpack.c.bf16 %v327_v32, %v325_v31  ;;  %v114_v31 = vld [vmem:[%s4185_s0 + $0x308] sm:$0xff] }
  0x51   :  { %645 = vmatmul.mubr.f32.gmra.mrb[6].mxu0 %v37_v40  ;;  %441 = vmatprep.mubr.f32.mxu1 %v42_v41  ;;  %v80_v39 = vld [vmem:[%s4185_s0 + $0x1f8] sm:$0xff]  ;;  %v2041_v40 = vpack.c.bf16 %v332_v34, %v330_v33  ;;  %v329_v41 = vld [vmem:[%s4184_s1 + $0x540] sm:$0xff] }
  0x52   :  { %650 = vmatprep.mubr.f32.mxu0 %v44_v43  ;;  %2016 = vmatpush1.bf16.msra.mxu0 %v2015_v42  ;;  %v334_v43 = vld [vmem:[%s4184_s1 + $0x568] sm:$0xff]  ;;  %v116_v33 = vld [vmem:[%s4185_s0 + $0x318] sm:$0xff]  ;;  %v113_v34 = vld [vmem:[%s4185_s0 + $0x300] sm:$0xff] }
  0x53   :  { %2084 = vmatpush1.bf16.msra.mxu1 %v2015_v42  ;;  %2018 = vmatprep.subr.bf16.mxu0 %v2017_v44  ;;  %v331_v42 = vld [vmem:[%s4184_s1 + $0x550] sm:$0xff] }
  0x54   :  { %442 = vmatmul.mubr.f32.gmra.mrb[8].mxu1 %v41_v49  ;;  %2069 = vmatprep.subr.bf16.mxu1 %v2017_v44  ;;  %v336_v44 = vld [vmem:[%s4184_s1 + $0x578] sm:$0xff]  ;;  %v2043_v48 = vpack.c.bf16 %v331_v42, %v329_v41  ;;  %v86_v49 = vld [vmem:[%s4185_s0 + $0x228] sm:$0xff]  ;;  %v125_v42 = vld [vmem:[%s4185_s0 + $0x360] sm:$0xff] }
  0x55   :  { %651 = vmatmul.mubr.f32.gmra.mrb[8].mxu0 %v43_v50  ;;  %447 = vmatprep.mubr.f32.mxu1 %v48_v51  ;;  %v2045_v50 = vpack.c.bf16 %v336_v44, %v334_v43  ;;  %v333_v51 = vld [vmem:[%s4184_s1 + $0x560] sm:$0xff]  ;;  %v128_v41 = vld [vmem:[%s4185_s0 + $0x378] sm:$0xff]  ;;  %v127_v43 = vld [vmem:[%s4185_s0 + $0x370] sm:$0xff] }
  0x56   :  { %656 = vmatprep.mubr.f32.mxu0 %v50_v53  ;;  %2020 = vmatpush1.bf16.msra.mxu0 %v2019_v52  ;;  %v338_v53 = vld [vmem:[%s4184_s1 + $0x588] sm:$0xff]  ;;  %v132_v44 = vld [vmem:[%s4185_s0 + $0x398] sm:$0xff] }
  0x57   :  { %2085 = vmatpush1.bf16.msra.mxu1 %v2019_v52  ;;  %2022 = vmatprep.subr.bf16.mxu0 %v2021_v54  ;;  %v335_v52 = vld [vmem:[%s4184_s1 + $0x570] sm:$0xff] }
  0x58   :  { %448 = vmatmul.mubr.f32.gmra.mrb[10].mxu1 %v47_v59  ;;  %2070 = vmatprep.subr.bf16.mxu1 %v2021_v54  ;;  %v340_v54 = vld [vmem:[%s4184_s1 + $0x598] sm:$0xff]  ;;  %v2047_v58 = vpack.c.bf16 %v335_v52, %v333_v51  ;;  %v139_v51 = vld [vmem:[%s4185_s0 + $0x3d0] sm:$0xff] }
  0x59   :  { %657 = vmatmul.mubr.f32.gmra.mrb[10].mxu0 %v49_v60  ;;  %453 = vmatprep.mubr.f32.mxu1 %v54_v61  ;;  %v92_v59 = vld [vmem:[%s4185_s0 + $0x258] sm:$0xff]  ;;  %v2049_v60 = vpack.c.bf16 %v340_v54, %v338_v53  ;;  %v337_v61 = vld [vmem:[%s4184_s1 + $0x580] sm:$0xff]  ;;  %v146_v53 = vld [vmem:[%s4185_s0 + $0x408] sm:$0xff] }
  0x5a   :  { %662 = vmatprep.mubr.f32.mxu0 %v56_v63  ;;  %2024 = vmatpush1.bf16.msra.mxu0 %v2023_v62  ;;  %v342_v63 = vld [vmem:[%s4184_s1 + $0x5a8] sm:$0xff]  ;;  %v144_v52 = vld [vmem:[%s4185_s0 + $0x3f8] sm:$0xff]  ;;  %v143_v54 = vld [vmem:[%s4185_s0 + $0x3f0] sm:$0xff] }
  0x5b   :  { %2086 = vmatpush1.bf16.msra.mxu1 %v2023_v62  ;;  %2026 = vmatprep.subr.bf16.mxu0 %v2025_v0  ;;  %v339_v62 = vld [vmem:[%s4184_s1 + $0x590] sm:$0xff] }
  0x5c   :  { %454 = vmatmul.mubr.f32.gmra.mrb[12].mxu1 %v53_v5  ;;  %2071 = vmatprep.subr.bf16.mxu1 %v2025_v0  ;;  %v344_v0 = vld [vmem:[%s4184_s1 + $0x5b8] sm:$0xff]  ;;  %v2051_v4 = vpack.c.bf16 %v339_v62, %v337_v61  ;;  %v98_v5 = vld [vmem:[%s4185_s0 + $0x288] sm:$0xff]  ;;  %v155_v62 = vld [vmem:[%s4185_s0 + $0x450] sm:$0xff] }
  0x5d   :  { %663 = vmatmul.mubr.f32.gmra.mrb[12].mxu0 %v55_v6  ;;  %459 = vmatprep.mubr.f32.mxu1 %v60_v7  ;;  %v2053_v6 = vpack.c.bf16 %v344_v0, %v342_v63  ;;  %v341_v7 = vld [vmem:[%s4184_s1 + $0x5a0] sm:$0xff]  ;;  %v158_v61 = vld [vmem:[%s4185_s0 + $0x468] sm:$0xff] }
  0x5e   :  { %668 = vmatprep.mubr.f32.mxu0 %v62_v9  ;;  %2028 = vmatpush1.bf16.msra.mxu0 %v2027_v8  ;;  %v346_v9 = vld [vmem:[%s4184_s1 + $0x5c8] sm:$0xff]  ;;  %v157_v63 = vld [vmem:[%s4185_s0 + $0x460] sm:$0xff] }
  0x5f   :  { %2087 = vmatpush1.bf16.msra.mxu1 %v2027_v8  ;;  %2030 = vmatprep.subr.bf16.mxu0 %v2029_v10  ;;  %v343_v8 = vld [vmem:[%s4184_s1 + $0x5b0] sm:$0xff]  ;;  %v94_v0 = vld [vmem:[%s4185_s0 + $0x268] sm:$0xff] }
  0x60   :  { %460 = vmatmul.mubr.f32.gmra.mrb[14].mxu1 %v59_v15  ;;  %2072 = vmatprep.subr.bf16.mxu1 %v2029_v10  ;;  %v348_v10 = vld [vmem:[%s4184_s1 + $0x5d8] sm:$0xff]  ;;  %v2055_v14 = vpack.c.bf16 %v343_v8, %v341_v7  ;;  %v27_v7 = vld [vmem:[%s4185_s0 + $0x50] sm:$0xff]  ;;  %v106_v8 = vld [vmem:[%s4185_s0 + $0x2c8] sm:$0xff] }
  0x61   :  { %669 = vmatmul.mubr.f32.gmra.mrb[14].mxu0 %v61_v16  ;;  %465 = vmatprep.mubr.f32.mxu1 %v66_v17  ;;  %v104_v15 = vld [vmem:[%s4185_s0 + $0x2b8] sm:$0xff]  ;;  %v2057_v16 = vpack.c.bf16 %v348_v10, %v346_v9  ;;  %v345_v17 = vld [vmem:[%s4184_s1 + $0x5c0] sm:$0xff]  ;;  %v34_v9 = vld [vmem:[%s4185_s0 + $0x88] sm:$0xff] }
  0x62   :  { %674 = vmatprep.mubr.f32.mxu0 %v68_v19  ;;  %2032 = vmatpush1.bf16.msra.mxu0 %v2031_v18  ;;  %v350_v19 = vld [vmem:[%s4184_s1 + $0x5e8] sm:$0xff]  ;;  %v105_v10 = vld [vmem:[%s4185_s0 + $0x2c0] sm:$0xff] }
  0x63   :  { %2088 = vmatpush1.bf16.msra.mxu1 %v2031_v18  ;;  %2034 = vmatprep.subr.bf16.mxu0 %v2033_v20  ;;  %v347_v18 = vld [vmem:[%s4184_s1 + $0x5d0] sm:$0xff] }
  0x64   :  { %466 = vmatmul.mubr.f32.gmra.mrb[16].mxu1 %v65_v25  ;;  %2073 = vmatprep.subr.bf16.mxu1 %v2033_v20  ;;  %v352_v20 = vld [vmem:[%s4184_s1 + $0x5f8] sm:$0xff]  ;;  %v2059_v24 = vpack.c.bf16 %v347_v18, %v345_v17  ;;  %v110_v25 = vld [vmem:[%s4185_s0 + $0x2e8] sm:$0xff]  ;;  %v117_v18 = vld [vmem:[%s4185_s0 + $0x320] sm:$0xff] }
  0x65   :  { %675 = vmatmul.mubr.f32.gmra.mrb[16].mxu0 %v67_v26  ;;  %471 = vmatprep.mubr.f32.mxu1 %v72_v27  ;;  %v2061_v26 = vpack.c.bf16 %v352_v20, %v350_v19  ;;  %v349_v27 = vld [vmem:[%s4184_s1 + $0x5e0] sm:$0xff]  ;;  %v46_v17 = vld [vmem:[%s4185_s0 + $0xe8] sm:$0xff]  ;;  %v124_v20 = vld [vmem:[%s4185_s0 + $0x358] sm:$0xff] }
  0x66   :  { %680 = vmatprep.mubr.f32.mxu0 %v74_v29  ;;  %2036 = vmatpush1.bf16.msra.mxu0 %v2035_v28  ;;  %v107_v29 = vld [vmem:[%s4185_s0 + $0x2d0] sm:$0xff]  ;;  %v45_v19 = vld [vmem:[%s4185_s0 + $0xe0] sm:$0xff] }
  0x67   :  { %2089 = vmatpush1.bf16.msra.mxu1 %v2035_v28  ;;  %2038 = vmatprep.subr.bf16.mxu0 %v2037_v30  ;;  %v351_v28 = vld [vmem:[%s4184_s1 + $0x5f0] sm:$0xff] }
  0x68   :  { %472 = vmatmul.mubr.f32.gmra.mrb[18].mxu1 %v71_v35  ;;  %2074 = vmatprep.subr.bf16.mxu1 %v2037_v30  ;;  %v109_v30 = vld [vmem:[%s4185_s0 + $0x2e0] sm:$0xff]  ;;  %v2063_v32 = vpack.c.bf16 %v351_v28, %v349_v27  ;;  %v115_v35 = vld [vmem:[%s4185_s0 + $0x310] sm:$0xff]  ;;  %v136_v28 = vld [vmem:[%s4185_s0 + $0x3b8] sm:$0xff] }
  0x69   :  { %681 = vmatmul.mubr.f32.gmra.mrb[18].mxu0 %v73_v36  ;;  %477 = vmatprep.mubr.f32.mxu1 %v78_v37  ;;  %v120_v36 = vld [vmem:[%s4185_s0 + $0x338] sm:$0xff]  ;;  %v122_v37 = vld [vmem:[%s4185_s0 + $0x348] sm:$0xff]  ;;  %v57_v27 = vld [vmem:[%s4185_s0 + $0x140] sm:$0xff] }
  0x6a   :  { %686 = vmatprep.mubr.f32.mxu0 %v80_v39  ;;  %2040 = vmatpush1.bf16.msra.mxu0 %v2039_v38  ;;  %v121_v39 = vld [vmem:[%s4185_s0 + $0x340] sm:$0xff] }
  0x6b   :  { %2090 = vmatpush1.bf16.msra.mxu1 %v2039_v38  ;;  %2042 = vmatprep.subr.bf16.mxu0 %v2041_v40  ;;  %v119_v38 = vld [vmem:[%s4185_s0 + $0x330] sm:$0xff] }
  0x6c   :  { %478 = vmatmul.mubr.f32.gmra.mrb[20].mxu1 %v77_v45  ;;  %2075 = vmatprep.subr.bf16.mxu1 %v2041_v40  ;;  %v126_v40 = vld [vmem:[%s4185_s0 + $0x368] sm:$0xff] }
  0x6d   :  { %687 = vmatmul.mubr.f32.gmra.mrb[20].mxu0 %v79_v46  ;;  %483 = vmatprep.mubr.f32.mxu1 %v84_v47  ;;  %v134_v45 = vld [vmem:[%s4185_s0 + $0x3a8] sm:$0xff]  ;;  %v131_v46 = vld [vmem:[%s4185_s0 + $0x390] sm:$0xff]  ;;  %v133_v47 = vld [vmem:[%s4185_s0 + $0x3a0] sm:$0xff] }
  0x6e   :  { %692 = vmatprep.mubr.f32.mxu0 %v86_v49  ;;  %2044 = vmatpush1.bf16.msra.mxu0 %v2043_v48  ;;  %v140_v49 = vld [vmem:[%s4185_s0 + $0x3d8] sm:$0xff] }
  0x6f   :  { %2091 = vmatpush1.bf16.msra.mxu1 %v2043_v48  ;;  %2046 = vmatprep.subr.bf16.mxu0 %v2045_v50  ;;  %v138_v48 = vld [vmem:[%s4185_s0 + $0x3c8] sm:$0xff] }
  0x70   :  { %484 = vmatmul.mubr.f32.gmra.mrb[22].mxu1 %v83_v55  ;;  %2076 = vmatprep.subr.bf16.mxu1 %v2045_v50  ;;  %v137_v50 = vld [vmem:[%s4185_s0 + $0x3c0] sm:$0xff] }
  0x71   :  { %693 = vmatmul.mubr.f32.gmra.mrb[22].mxu0 %v85_v56  ;;  %489 = vmatprep.mubr.f32.mxu1 %v90_v57  ;;  %v145_v55 = vld [vmem:[%s4185_s0 + $0x400] sm:$0xff]  ;;  %v150_v56 = vld [vmem:[%s4185_s0 + $0x428] sm:$0xff]  ;;  %v152_v57 = vld [vmem:[%s4185_s0 + $0x438] sm:$0xff] }
  0x72   :  { %698 = vmatprep.mubr.f32.mxu0 %v92_v59  ;;  %2048 = vmatpush1.bf16.msra.mxu0 %v2047_v58  ;;  %v151_v59 = vld [vmem:[%s4185_s0 + $0x430] sm:$0xff] }
  0x73   :  { %2092 = vmatpush1.bf16.msra.mxu1 %v2047_v58  ;;  %2050 = vmatprep.subr.bf16.mxu0 %v2049_v60  ;;  %v149_v58 = vld [vmem:[%s4185_s0 + $0x420] sm:$0xff] }
  0x74   :  { %490 = vmatmul.mubr.f32.gmra.mrb[24].mxu1 %v89_v1  ;;  %2077 = vmatprep.subr.bf16.mxu1 %v2049_v60  ;;  %v156_v60 = vld [vmem:[%s4185_s0 + $0x458] sm:$0xff]  ;;  %v22_v1 = vld [vmem:[%s4185_s0 + $0x28] sm:$0xff] }
  0x75   :  { %699 = vmatmul.mubr.f32.gmra.mrb[24].mxu0 %v91_v2  ;;  %495 = vmatprep.mubr.f32.mxu1 %v96_v3  ;;  %v93_v2 = vld [vmem:[%s4185_s0 + $0x260] sm:$0xff] }
  0x76   :  { %704 = vmatprep.mubr.f32.mxu0 %v98_v5  ;;  %2052 = vmatpush1.bf16.msra.mxu0 %v2051_v4  ;;  %v21_v3 = vld [vmem:[%s4185_s0 + $0x20] sm:$0xff]  ;;  %v28_v5 = vld [vmem:[%s4185_s0 + $0x58] sm:$0xff] }
  0x77   :  { %2093 = vmatpush1.bf16.msra.mxu1 %v2051_v4  ;;  %2054 = vmatprep.subr.bf16.mxu0 %v2053_v6  ;;  %v100_v4 = vld [vmem:[%s4185_s0 + $0x298] sm:$0xff] }
  0x78   :  { %496 = vmatmul.mubr.f32.gmra.mrb[26].mxu1 %v95_v11  ;;  %2078 = vmatprep.subr.bf16.mxu1 %v2053_v6  ;;  %v99_v6 = vld [vmem:[%s4185_s0 + $0x290] sm:$0xff]  ;;  %v33_v11 = vld [vmem:[%s4185_s0 + $0x80] sm:$0xff] }
  0x79   :  { %705 = vmatmul.mubr.f32.gmra.mrb[26].mxu0 %v97_v12  ;;  %501 = vmatprep.mubr.f32.mxu1 %v102_v13  ;;  %v112_v12 = vld [vmem:[%s4185_s0 + $0x2f8] sm:$0xff] }
  0x7a   :  { %710 = vmatprep.mubr.f32.mxu0 %v104_v15  ;;  %2056 = vmatpush1.bf16.msra.mxu0 %v2055_v14  ;;  %v40_v13 = vld [vmem:[%s4185_s0 + $0xb8] sm:$0xff]  ;;  %v39_v15 = vld [vmem:[%s4185_s0 + $0xb0] sm:$0xff] }
  0x7b   :  { %2094 = vmatpush1.bf16.msra.mxu1 %v2055_v14  ;;  %2058 = vmatprep.subr.bf16.mxu0 %v2057_v16  ;;  %v111_v14 = vld [vmem:[%s4185_s0 + $0x2f0] sm:$0xff] }
  0x7c   :  { %502 = vmatmul.mubr.f32.gmra.mrb[28].mxu1 %v101_v21  ;;  %2079 = vmatprep.subr.bf16.mxu1 %v2057_v16  ;;  %v118_v16 = vld [vmem:[%s4185_s0 + $0x328] sm:$0xff]  ;;  %v52_v21 = vld [vmem:[%s4185_s0 + $0x118] sm:$0xff] }
  0x7d   :  { %711 = vmatmul.mubr.f32.gmra.mrb[28].mxu0 %v103_v22  ;;  %507 = vmatprep.mubr.f32.mxu1 %v108_v23  ;;  %v123_v22 = vld [vmem:[%s4185_s0 + $0x350] sm:$0xff] }
  0x7e   :  { %716 = vmatprep.mubr.f32.mxu0 %v110_v25  ;;  %2060 = vmatpush1.bf16.msra.mxu0 %v2059_v24  ;;  %v51_v23 = vld [vmem:[%s4185_s0 + $0x110] sm:$0xff]  ;;  %v58_v25 = vld [vmem:[%s4185_s0 + $0x148] sm:$0xff] }
  0x7f   :  { %2095 = vmatpush1.bf16.msra.mxu1 %v2059_v24  ;;  %2062 = vmatprep.subr.bf16.mxu0 %v2061_v26  ;;  %v130_v24 = vld [vmem:[%s4185_s0 + $0x388] sm:$0xff] }
  0x80   :  { %508 = vmatmul.mubr.f32.gmra.mrb[30].mxu1 %v107_v29  ;;  %2080 = vmatprep.subr.bf16.mxu1 %v2061_v26  ;;  %v129_v26 = vld [vmem:[%s4185_s0 + $0x380] sm:$0xff]  ;;  %v64_v29 = vld [vmem:[%s4185_s0 + $0x178] sm:$0xff] }
  0x81   :  { %717 = vmatmul.mubr.f32.gmra.mrb[30].mxu0 %v109_v30  ;;  %513 = vmatprep.mubr.f32.mxu1 %v114_v31  ;;  %v135_v30 = vld [vmem:[%s4185_s0 + $0x3b0] sm:$0xff] }
  0x82   :  { %722 = vmatprep.mubr.f32.mxu0 %v116_v33  ;;  %2064 = vmatpush1.bf16.msra.mxu0 %v2063_v32  ;;  %v63_v31 = vld [vmem:[%s4185_s0 + $0x170] sm:$0xff]  ;;  %v70_v33 = vld [vmem:[%s4185_s0 + $0x1a8] sm:$0xff] }
  0x83   :  { %2096 = vmatpush1.bf16.msra.mxu1 %v2063_v32  ;;  %v142_v32 = vld [vmem:[%s4185_s0 + $0x3e8] sm:$0xff] }
  0x84   :  { %514 = vmatmul.mubr.f32.gmra.mrb[32].mxu1 %v113_v34  ;;  %v141_v34 = vld [vmem:[%s4185_s0 + $0x3e0] sm:$0xff] }
  0x85   :  { %723 = vmatmul.mubr.f32.gmra.mrb[32].mxu0 %v115_v35  ;;  %519 = vmatprep.mubr.f32.mxu1 %v120_v36  ;;  %v69_v35 = vld [vmem:[%s4185_s0 + $0x1a0] sm:$0xff]  ;;  %v148_v36 = vld [vmem:[%s4185_s0 + $0x418] sm:$0xff] }
  0x86   :  { %728 = vmatprep.mubr.f32.mxu0 %v122_v37  ;;  %v76_v37 = vld [vmem:[%s4185_s0 + $0x1d8] sm:$0xff] }
  0x88   :  { %520 = vmatmul.mubr.f32.gmra.mrb[34].mxu1 %v119_v38  ;;  %v147_v38 = vld [vmem:[%s4185_s0 + $0x410] sm:$0xff] }
  0x89   :  { %729 = vmatmul.mubr.f32.gmra.mrb[34].mxu0 %v121_v39  ;;  %525 = vmatprep.mubr.f32.mxu1 %v126_v40  ;;  %v75_v39 = vld [vmem:[%s4185_s0 + $0x1d0] sm:$0xff]  ;;  %v154_v40 = vld [vmem:[%s4185_s0 + $0x448] sm:$0xff] }
  0x8a   :  { %734 = vmatprep.mubr.f32.mxu0 %v128_v41  ;;  %v82_v41 = vld [vmem:[%s4185_s0 + $0x208] sm:$0xff] }
  0x8c   :  { %526 = vmatmul.mubr.f32.gmra.mrb[36].mxu1 %v125_v42  ;;  %v153_v42 = vld [vmem:[%s4185_s0 + $0x440] sm:$0xff] }
  0x8d   :  { %735 = vmatmul.mubr.f32.gmra.mrb[36].mxu0 %v127_v43  ;;  %531 = vmatprep.mubr.f32.mxu1 %v132_v44  ;;  %v81_v43 = vld [vmem:[%s4185_s0 + $0x200] sm:$0xff]  ;;  %v160_v44 = vld [vmem:[%s4185_s0 + $0x478] sm:$0xff] }
  0x8e   :  { %740 = vmatprep.mubr.f32.mxu0 %v134_v45  ;;  %v88_v45 = vld [vmem:[%s4185_s0 + $0x238] sm:$0xff] }
  0x90   :  { %532 = vmatmul.mubr.f32.gmra.mrb[38].mxu1 %v131_v46  ;;  %v159_v46 = vld [vmem:[%s4185_s0 + $0x470] sm:$0xff] }
  0x91   :  { %741 = vmatmul.mubr.f32.gmra.mrb[38].mxu0 %v133_v47  ;;  %537 = vmatprep.mubr.f32.mxu1 %v138_v48  ;;  %v87_v47 = vld [vmem:[%s4185_s0 + $0x230] sm:$0xff] }
  0x92   :  { %746 = vmatprep.mubr.f32.mxu0 %v140_v49 }
  0x94   :  { %538 = vmatmul.mubr.f32.gmra.mrb[40].mxu1 %v137_v50 }
  0x95   :  { %747 = vmatmul.mubr.f32.gmra.mrb[40].mxu0 %v139_v51  ;;  %543 = vmatprep.mubr.f32.mxu1 %v144_v52 }
  0x96   :  { %752 = vmatprep.mubr.f32.mxu0 %v146_v53 }
  0x98   :  { %544 = vmatmul.mubr.f32.gmra.mrb[42].mxu1 %v143_v54 }
  0x99   :  { %753 = vmatmul.mubr.f32.gmra.mrb[42].mxu0 %v145_v55  ;;  %549 = vmatprep.mubr.f32.mxu1 %v150_v56 }
  0x9a   :  { %758 = vmatprep.mubr.f32.mxu0 %v152_v57 }
  0x9c   :  { %550 = vmatmul.mubr.f32.gmra.mrb[44].mxu1 %v149_v58 }
  0x9d   :  { %759 = vmatmul.mubr.f32.gmra.mrb[44].mxu0 %v151_v59  ;;  %555 = vmatprep.mubr.f32.mxu1 %v156_v60 }
  0x9e   :  { %764 = vmatprep.mubr.f32.mxu0 %v158_v61 }
  0xa0   :  { %556 = vmatmul.mubr.f32.gmra.mrb[46].mxu1 %v155_v62 }
  0xa1   :  { %765 = vmatmul.mubr.f32.gmra.mrb[46].mxu0 %v157_v63  ;;  %907 = vmatprep.mubr.f32.mxu1 %v94_v0 }
  0xa2   :  { %835 = vmatprep.mubr.f32.mxu0 %v22_v1 }
  0xa4   :  { %908 = vmatmul.mubr.f32.vlgmr.msra.gmra.mrb[48].mxu1 %v93_v2 }
  0xa5   :  { %836 = vmatmul.mubr.f32.vlgmr.msra.gmra.mrb[0].mxu0 %v21_v3  ;;  %913 = vmatprep.mubr.f32.mxu1 %v100_v4 }
  0xa6   :  { %841 = vmatprep.mubr.f32.mxu0 %v28_v5 }
  0xa8   :  { %914 = vmatmul.mubr.f32.gmra.mrb[50].mxu1 %v99_v6 }
  0xa9   :  { %842 = vmatmul.mubr.f32.gmra.mrb[2].mxu0 %v27_v7  ;;  %919 = vmatprep.mubr.f32.mxu1 %v106_v8 }
  0xaa   :  { %847 = vmatprep.mubr.f32.mxu0 %v34_v9 }
  0xac   :  { %920 = vmatmul.mubr.f32.gmra.mrb[52].mxu1 %v105_v10 }
  0xad   :  { %848 = vmatmul.mubr.f32.gmra.mrb[4].mxu0 %v33_v11  ;;  %925 = vmatprep.mubr.f32.mxu1 %v112_v12 }
  0xae   :  { %853 = vmatprep.mubr.f32.mxu0 %v40_v13 }
  0xb0   :  { %926 = vmatmul.mubr.f32.gmra.mrb[54].mxu1 %v111_v14 }
  0xb1   :  { %854 = vmatmul.mubr.f32.gmra.mrb[6].mxu0 %v39_v15  ;;  %931 = vmatprep.mubr.f32.mxu1 %v118_v16 }
  0xb2   :  { %859 = vmatprep.mubr.f32.mxu0 %v46_v17 }
  0xb4   :  { %932 = vmatmul.mubr.f32.gmra.mrb[56].mxu1 %v117_v18 }
  0xb5   :  { %860 = vmatmul.mubr.f32.gmra.mrb[8].mxu0 %v45_v19  ;;  %937 = vmatprep.mubr.f32.mxu1 %v124_v20 }
  0xb6   :  { %865 = vmatprep.mubr.f32.mxu0 %v52_v21 }
  0xb8   :  { %938 = vmatmul.mubr.f32.gmra.mrb[58].mxu1 %v123_v22 }
  0xb9   :  { %866 = vmatmul.mubr.f32.gmra.mrb[10].mxu0 %v51_v23  ;;  %943 = vmatprep.mubr.f32.mxu1 %v130_v24 }
  0xba   :  { %871 = vmatprep.mubr.f32.mxu0 %v58_v25 }
  0xbc   :  { %944 = vmatmul.mubr.f32.gmra.mrb[60].mxu1 %v129_v26 }
  0xbd   :  { %872 = vmatmul.mubr.f32.gmra.mrb[12].mxu0 %v57_v27  ;;  %949 = vmatprep.mubr.f32.mxu1 %v136_v28 }
  0xbe   :  { %877 = vmatprep.mubr.f32.mxu0 %v64_v29 }
  0xc0   :  { %950 = vmatmul.mubr.f32.gmra.mrb[62].mxu1 %v135_v30 }
  0xc1   :  { %878 = vmatmul.mubr.f32.gmra.mrb[14].mxu0 %v63_v31  ;;  %955 = vmatprep.mubr.f32.mxu1 %v142_v32 }
  0xc2   :  { %883 = vmatprep.mubr.f32.mxu0 %v70_v33 }
  0xc4   :  { %956 = vmatmul.mubr.f32.gmra.mrb[64].mxu1 %v141_v34 }
  0xc5   :  { %884 = vmatmul.mubr.f32.gmra.mrb[16].mxu0 %v69_v35  ;;  %961 = vmatprep.mubr.f32.mxu1 %v148_v36 }
  0xc6   :  { %889 = vmatprep.mubr.f32.mxu0 %v76_v37 }
  0xc8   :  { %962 = vmatmul.mubr.f32.gmra.mrb[66].mxu1 %v147_v38 }
  0xc9   :  { %890 = vmatmul.mubr.f32.gmra.mrb[18].mxu0 %v75_v39  ;;  %967 = vmatprep.mubr.f32.mxu1 %v154_v40 }
  0xca   :  { %895 = vmatprep.mubr.f32.mxu0 %v82_v41 }
  0xcc   :  { %968 = vmatmul.mubr.f32.gmra.mrb[68].mxu1 %v153_v42 }
  0xcd   :  { %896 = vmatmul.mubr.f32.gmra.mrb[20].mxu0 %v81_v43  ;;  %973 = vmatprep.mubr.f32.mxu1 %v160_v44 }
  0xce   :  { %901 = vmatprep.mubr.f32.mxu0 %v88_v45 }
  0xd0   :  { %974 = vmatmul.mubr.f32.gmra.mrb[70].mxu1 %v159_v46 }
  0xd1   :  { %902 = vmatmul.mubr.f32.gmra.mrb[22].mxu0 %v87_v47 }
 0x117   :  { %v3278_v48 = vpop.f32.mrb[0].mxu1 }
 0x118   :  { %v3280_v49 = vpop.f32.mrb[1].mxu1 }
 0x11b   :  { %v3282_v50 = vpop.f32.mrb[2].mxu1 }
 0x11c   :  { %v3284_v51 = vpop.f32.mrb[3].mxu1 }
 0x11f   :  { %v3286_v52 = vpop.f32.mrb[4].mxu1 }
 0x120   :  { %v3288_v53 = vpop.f32.mrb[5].mxu1 }
 0x123   :  { %v3290_v54 = vpop.f32.mrb[6].mxu1 }
 0x124   :  { %v3292_v55 = vpop.f32.mrb[7].mxu1 }
 0x127   :  { %v3294_v56 = vpop.f32.mrb[8].mxu1 }
 0x128   :  { %v3296_v57 = vpop.f32.mrb[9].mxu1 }
 0x12b   :  { %v3298_v58 = vpop.f32.mrb[10].mxu1 }
 0x12c   :  { %v3300_v59 = vpop.f32.mrb[11].mxu1 }
 0x12f   :  { %v3302_v60 = vpop.f32.mrb[12].mxu1 }
 0x130   :  { %v3304_v61 = vpop.f32.mrb[13].mxu1 }
 0x133   :  { %v3306_v62 = vpop.f32.mrb[14].mxu1 }
 0x134   :  { %v3308_v63 = vpop.f32.mrb[15].mxu1 }
 0x137   :  { %v3310_v0 = vpop.f32.mrb[16].mxu1 }
 0x138   :  { %v3312_v1 = vpop.f32.mrb[17].mxu1 }
 0x13b   :  { %v3314_v2 = vpop.f32.mrb[18].mxu1 }
 0x13c   :  { %v3316_v3 = vpop.f32.mrb[19].mxu1 }
 0x13f   :  { %v3318_v4 = vpop.f32.mrb[20].mxu1 }
 0x140   :  { %v3320_v5 = vpop.f32.mrb[21].mxu1 }
 0x143   :  { %v3322_v6 = vpop.f32.mrb[22].mxu1 }
 0x144   :  { %v3324_v7 = vpop.f32.mrb[23].mxu1 }
 0x147   :  { %v491_v8 = vpop.f32.mrb[24].mxu1 }
 0x148   :  { %v700_v9 = vpop.f32.mrb[24].mxu0  ;;  %v493_v10 = vpop.f32.mrb[25].mxu1 }
 0x149   :  { %v3326_v11 = vadd.f32 %v700_v9, %v491_v8  ;;  %v702_v12 = vpop.f32.mrb[25].mxu0 }
 0x14a   :  { %v3328_v13 = vadd.f32 %v702_v12, %v493_v10 }
 0x14b   :  { %v497_v14 = vpop.f32.mrb[26].mxu1 }
 0x14c   :  { %v706_v15 = vpop.f32.mrb[26].mxu0  ;;  %v499_v16 = vpop.f32.mrb[27].mxu1 }
 0x14d   :  { %v3330_v17 = vadd.f32 %v706_v15, %v497_v14  ;;  %v708_v18 = vpop.f32.mrb[27].mxu0 }
 0x14e   :  { %v3332_v19 = vadd.f32 %v708_v18, %v499_v16 }
 0x14f   :  { %v503_v20 = vpop.f32.mrb[28].mxu1 }
 0x150   :  { %v712_v21 = vpop.f32.mrb[28].mxu0  ;;  %v505_v22 = vpop.f32.mrb[29].mxu1 }
 0x151   :  { %v3334_v23 = vadd.f32 %v712_v21, %v503_v20  ;;  %v714_v24 = vpop.f32.mrb[29].mxu0 }
 0x152   :  { %v3336_v25 = vadd.f32 %v714_v24, %v505_v22 }
 0x153   :  { %v509_v26 = vpop.f32.mrb[30].mxu1 }
 0x154   :  { %v718_v27 = vpop.f32.mrb[30].mxu0  ;;  %v511_v28 = vpop.f32.mrb[31].mxu1 }
 0x155   :  { %v3338_v29 = vadd.f32 %v718_v27, %v509_v26  ;;  %v720_v30 = vpop.f32.mrb[31].mxu0 }
 0x156   :  { %v3340_v31 = vadd.f32 %v720_v30, %v511_v28 }
 0x157   :  { %v515_v32 = vpop.f32.mrb[32].mxu1 }
 0x158   :  { %v724_v33 = vpop.f32.mrb[32].mxu0  ;;  %v517_v34 = vpop.f32.mrb[33].mxu1 }
 0x159   :  { %v3342_v35 = vadd.f32 %v724_v33, %v515_v32  ;;  %v726_v36 = vpop.f32.mrb[33].mxu0 }
 0x15a   :  { %v3344_v37 = vadd.f32 %v726_v36, %v517_v34 }
 0x15b   :  { %v521_v38 = vpop.f32.mrb[34].mxu1 }
 0x15c   :  { %v730_v39 = vpop.f32.mrb[34].mxu0  ;;  %v523_v40 = vpop.f32.mrb[35].mxu1 }
 0x15d   :  { %v3346_v41 = vadd.f32 %v730_v39, %v521_v38  ;;  %v732_v42 = vpop.f32.mrb[35].mxu0 }
 0x15e   :  { %v3348_v43 = vadd.f32 %v732_v42, %v523_v40 }
 0x15f   :  { %v527_v44 = vpop.f32.mrb[36].mxu1 }
 0x160   :  { %v736_v45 = vpop.f32.mrb[36].mxu0  ;;  %v529_v46 = vpop.f32.mrb[37].mxu1 }
 0x161   :  { %v3350_v47 = vadd.f32 %v736_v45, %v527_v44  ;;  %v738_v8 = vpop.f32.mrb[37].mxu0 }
 0x162   :  { %v3352_v9 = vadd.f32 %v738_v8, %v529_v46 }
 0x163   :  { %v533_v10 = vpop.f32.mrb[38].mxu1 }
 0x164   :  { %v742_v12 = vpop.f32.mrb[38].mxu0  ;;  %v535_v14 = vpop.f32.mrb[39].mxu1 }
 0x165   :  { %v3354_v15 = vadd.f32 %v742_v12, %v533_v10  ;;  %v744_v16 = vpop.f32.mrb[39].mxu0 }
 0x166   :  { %v3356_v18 = vadd.f32 %v744_v16, %v535_v14 }
 0x167   :  { %v539_v20 = vpop.f32.mrb[40].mxu1 }
 0x168   :  { %v748_v21 = vpop.f32.mrb[40].mxu0  ;;  %v541_v22 = vpop.f32.mrb[41].mxu1 }
 0x169   :  { %v3358_v24 = vadd.f32 %v748_v21, %v539_v20  ;;  %v750_v26 = vpop.f32.mrb[41].mxu0 }
 0x16a   :  { %v3360_v27 = vadd.f32 %v750_v26, %v541_v22 }
 0x16b   :  { %v545_v28 = vpop.f32.mrb[42].mxu1 }
 0x16c   :  { %v754_v30 = vpop.f32.mrb[42].mxu0  ;;  %v547_v32 = vpop.f32.mrb[43].mxu1 }
 0x16d   :  { %v3362_v33 = vadd.f32 %v754_v30, %v545_v28  ;;  %v756_v34 = vpop.f32.mrb[43].mxu0 }
 0x16e   :  { %v3364_v36 = vadd.f32 %v756_v34, %v547_v32 }
 0x16f   :  { %v551_v38 = vpop.f32.mrb[44].mxu1 }
 0x170   :  { %v760_v39 = vpop.f32.mrb[44].mxu0  ;;  %v553_v40 = vpop.f32.mrb[45].mxu1 }
 0x171   :  { %v3366_v42 = vadd.f32 %v760_v39, %v551_v38  ;;  %v762_v44 = vpop.f32.mrb[45].mxu0 }
 0x172   :  { %v3368_v45 = vadd.f32 %v762_v44, %v553_v40 }
 0x173   :  { %v557_v46 = vpop.f32.mrb[46].mxu1 }
 0x174   :  { %v766_v8 = vpop.f32.mrb[46].mxu0  ;;  %v559_v10 = vpop.f32.mrb[47].mxu1 }
 0x175   :  { %v3370_v12 = vadd.f32 %v766_v8, %v557_v46  ;;  %v768_v14 = vpop.f32.mrb[47].mxu0 }
 0x176   :  { %v3372_v16 = vadd.f32 %v768_v14, %v559_v10 }
 0x177   :  { %v909_v20 = vpop.f32.mrb[48].mxu1 }
 0x178   :  { %v837_v21 = vpop.f32.mrb[0].mxu0  ;;  %v3375_v22 = vadd.f32 %v909_v20, %v3326_v11  ;;  %v911_v26 = vpop.f32.mrb[49].mxu1 }
 0x179   :  { %v3378_v28 = vadd.f32 %v837_v21, %v3278_v48  ;;  %v839_v30 = vpop.f32.mrb[1].mxu0  ;;  %v3381_v32 = vadd.f32 %v911_v26, %v3328_v13 }
 0x17a   :  { %v3384_v34 = vadd.f32 %v839_v30, %v3280_v49 }
 0x17b   :  { %4205 = vst [vmem:[#allocation2_spill] sm:$0xff] %v3381_v32  ;;  %v915_v38 = vpop.f32.mrb[50].mxu1  ;;  %v1102_v30 = vmul.f32 %v3381_v32, %v3381_v32 }
 0x17c   :  { %v843_v39 = vpop.f32.mrb[2].mxu0  ;;  %v3387_v40 = vadd.f32 %v915_v38, %v3330_v17  ;;  %v917_v44 = vpop.f32.mrb[51].mxu1  ;;  %v981_v11 = vsel %vm980_vm0, %v3384_v34, 0.0  ;;  %v1029_v17 = vsel %vm980_vm0, %v3381_v32, 0.0  ;;  %v1078_v10 = vmul.f32 %v3384_v34, %v3384_v34 }
 0x17d   :  { %v3392_v48 = vadd.f32 %v843_v39, %v3282_v50  ;;  %v845_v46 = vpop.f32.mrb[3].mxu0  ;;  %v3395_v13 = vadd.f32 %v917_v44, %v3332_v19  ;;  %v982_v8 = vadd.f32 %v3378_v28, %v981_v11  ;;  %v1030_v11 = vadd.f32 %v1029_v17, %v3375_v22 }
 0x17e   :  { %v3399_v49 = vadd.f32 %v845_v46, %v3284_v51 }
 0x17f   :  { %4206 = vst [vmem:[#allocation3_spill] sm:$0xff] %v3395_v13  ;;  %983 = vadd.xlane.f32.xlu0 %v982_v8  ;;  %v921_v14 = vpop.f32.mrb[52].mxu1  ;;  %v1033_v50 = vsel %vm980_vm0, %v3395_v13, 0.0  ;;  %v1079_v8 = vmul.f32 %v3392_v48, %v3392_v48 }
 0x180   :  { %v849_v20 = vpop.f32.mrb[4].mxu0  ;;  %v3408_v19 = vadd.f32 %v921_v14, %v3334_v23  ;;  %v923_v21 = vpop.f32.mrb[53].mxu1  ;;  %v1034_v26 = vadd.f32 %v1033_v50, %v3387_v40  ;;  %v1080_v51 = vmul.f32 %v3399_v49, %v3399_v49  ;;  %v1104_v23 = vmul.f32 %v3395_v13, %v3395_v13 }
 0x181   :  { %v3416_v38 = vadd.f32 %v849_v20, %v3286_v52  ;;  %v851_v39 = vpop.f32.mrb[5].mxu0  ;;  %v3419_v44 = vadd.f32 %v923_v21, %v3336_v25  ;;  %v1125_v52 = vsel %vm980_vm0, %v1078_v10, 0.0  ;;  %v1077_v25 = vmul.f32 %v3378_v28, %v3378_v28 }
 0x182   :  { %v3425_v46 = vadd.f32 %v851_v39, %v3288_v53  ;;  %1035 = vadd.xlane.f32.xlu1 %v1034_v26  ;;  %v1129_v14 = vsel %vm980_vm0, %v1080_v51, 0.0  ;;  %v1173_v26 = vsel %vm980_vm0, %v1102_v30, 0.0  ;;  %v1101_v30 = vmul.f32 %v3375_v22, %v3375_v22 }
 0x183   :  { %1031 = vadd.xlane.f32.xlu0 %v1030_v11  ;;  %v927_v50 = vpop.f32.mrb[54].mxu1  ;;  %v1130_v53 = vadd.f32 %v1129_v14, %v1079_v8  ;;  %v1126_v10 = vadd.f32 %v1125_v52, %v1077_v25  ;;  %v1177_v11 = vsel %vm980_vm0, %v1104_v23, 0.0 }
 0x184   :  { %v855_v17 = vpop.f32.mrb[6].mxu0  ;;  %v3434_v20 = vadd.f32 %v927_v50, %v3338_v29  ;;  %v929_v21 = vpop.f32.mrb[55].mxu1  ;;  %v1103_v29 = vmul.f32 %v3387_v40, %v3387_v40  ;;  %v1174_v50 = vadd.f32 %v1173_v26, %v1101_v30  ;;  %v989_v25 = vsel %vm980_vm0, %v3425_v46, 0.0 }
 0x185   :  { %v3438_v39 = vadd.f32 %v855_v17, %v3290_v54  ;;  %v857_v32 = vpop.f32.mrb[7].mxu0  ;;  %v3441_v51 = vadd.f32 %v929_v21, %v3340_v31  ;;  %v985_v17 = vsel %vm980_vm0, %v3399_v49, 0.0 }
 0x186   :  { %v3445_v13 = vadd.f32 %v857_v32, %v3292_v55  ;;  %1131 = vadd.xlane.f32.xlu1 %v1130_v53  ;;  %v1178_v52 = vadd.f32 %v1177_v11, %v1103_v29  ;;  %v1082_v11 = vmul.f32 %v3425_v46, %v3425_v46 }
 0x187   :  { %1127 = vadd.xlane.f32.xlu0 %v1126_v10  ;;  %v933_v54 = vpop.f32.mrb[56].mxu1  ;;  %v986_v10 = vadd.f32 %v3392_v48, %v985_v17 }
 0x188   :  { %v861_v8 = vpop.f32.mrb[8].mxu0  ;;  %v3452_v14 = vadd.f32 %v933_v54, %v3342_v35  ;;  %v935_v31 = vpop.f32.mrb[57].mxu1  ;;  %v993_v54 = vsel %vm980_vm0, %v3445_v13, 0.0 }
 0x189   :  { %v3455_v23 = vadd.f32 %v861_v8, %v3294_v56  ;;  %v863_v55 = vpop.f32.mrb[9].mxu0  ;;  %v3458_v32 = vadd.f32 %v935_v31, %v3344_v37  ;;  %v990_v37 = vadd.f32 %v3416_v38, %v989_v25  ;;  %v1133_v25 = vsel %vm980_vm0, %v1082_v11, 0.0 }
 0x18a   :  { %v3465_v21 = vadd.f32 %v863_v55, %v3296_v57  ;;  %1179 = vadd.xlane.f32.xlu1 %v1178_v52 }
 0x18b   :  { %1175 = vadd.xlane.f32.xlu0 %v1174_v50  ;;  %v939_v35 = vpop.f32.mrb[58].mxu1 }
 0x18c   :  { %v867_v53 = vpop.f32.mrb[10].mxu0  ;;  %v3468_v56 = vadd.f32 %v939_v35, %v3346_v41  ;;  %v941_v26 = vpop.f32.mrb[59].mxu1  ;;  %v1037_v41 = vsel %vm980_vm0, %v3419_v44, 0.0 }
 0x18d   :  { %v3475_v29 = vadd.f32 %v867_v53, %v3298_v58  ;;  %v869_v57 = vpop.f32.mrb[11].mxu0  ;;  %v3478_v30 = vadd.f32 %v941_v26, %v3348_v43  ;;  %v994_v43 = vadd.f32 %v3438_v39, %v993_v54  ;;  %v1038_v55 = vadd.f32 %v1037_v41, %v3408_v19 }
 0x18e   :  { %v3485_v8 = vadd.f32 %v869_v57, %v3300_v59  ;;  %991 = vadd.xlane.f32.xlu1 %v990_v37  ;;  %v1041_v53 = vsel %vm980_vm0, %v3441_v51, 0.0  ;;  %v1081_v37 = vmul.f32 %v3416_v38, %v3416_v38 }
 0x18f   :  { %987 = vadd.xlane.f32.xlu0 %v986_v10  ;;  %v945_v31 = vpop.f32.mrb[60].mxu1  ;;  %v1042_v54 = vadd.f32 %v1041_v53, %v3434_v20 }
 0x190   :  { %v873_v52 = vpop.f32.mrb[12].mxu0  ;;  %v3488_v58 = vadd.f32 %v945_v31, %v3350_v47  ;;  %v947_v50 = vpop.f32.mrb[61].mxu1  ;;  %v1084_v47 = vmul.f32 %v3445_v13, %v3445_v13  ;;  %v1134_v41 = vadd.f32 %v1133_v25, %v1081_v37 }
 0x191   :  { %v3494_v17 = vadd.f32 %v873_v52, %v3302_v60  ;;  %v875_v35 = vpop.f32.mrb[13].mxu0  ;;  %v3497_v59 = vadd.f32 %v947_v50, %v3352_v9  ;;  %v1106_v60 = vmul.f32 %v3419_v44, %v3419_v44 }
 0x192   :  { %v3504_v26 = vadd.f32 %v875_v35, %v3304_v61  ;;  %995 = vadd.xlane.f32.xlu1 %v994_v43  ;;  %v1137_v50 = vsel %vm980_vm0, %v1084_v47, 0.0  ;;  %v1108_v43 = vmul.f32 %v3441_v51, %v3441_v51 }
 0x193   :  { %1039 = vadd.xlane.f32.xlu0 %v1038_v55  ;;  %v951_v10 = vpop.f32.mrb[62].mxu1  ;;  %v1181_v25 = vsel %vm980_vm0, %v1106_v60, 0.0 }
 0x194   :  { %v879_v9 = vpop.f32.mrb[14].mxu0  ;;  %v3511_v11 = vadd.f32 %v951_v10, %v3354_v15  ;;  %v953_v57 = vpop.f32.mrb[63].mxu1  ;;  %v1083_v15 = vmul.f32 %v3438_v39, %v3438_v39  ;;  %v1185_v60 = vsel %vm980_vm0, %v1108_v43, 0.0  ;;  %v1045_v43 = vsel %vm980_vm0, %v3458_v32, 0.0 }
 0x195   :  { %v3515_v61 = vadd.f32 %v879_v9, %v3306_v62  ;;  %v881_v31 = vpop.f32.mrb[15].mxu0  ;;  %v3518_v52 = vadd.f32 %v953_v57, %v3356_v18  ;;  %v1105_v18 = vmul.f32 %v3408_v19, %v3408_v19 }
 0x196   :  { %v3524_v55 = vadd.f32 %v881_v31, %v3308_v63  ;;  %1043 = vadd.xlane.f32.xlu1 %v1042_v54  ;;  %v1138_v37 = vadd.f32 %v1137_v50, %v1083_v15 }
 0x197   :  { %1135 = vadd.xlane.f32.xlu0 %v1134_v41  ;;  %v957_v62 = vpop.f32.mrb[64].mxu1  ;;  %v1182_v57 = vadd.f32 %v1181_v25, %v1105_v18  ;;  %v997_v41 = vsel %vm980_vm0, %v3465_v21, 0.0 }
 0x198   :  { %v885_v35 = vpop.f32.mrb[16].mxu0  ;;  %v3532_v53 = vadd.f32 %v957_v62, %v3358_v24  ;;  %v959_v47 = vpop.f32.mrb[65].mxu1  ;;  %v1107_v24 = vmul.f32 %v3434_v20, %v3434_v20 }
 0x199   :  { %v3535_v63 = vadd.f32 %v885_v35, %v3310_v0  ;;  %v887_v10 = vpop.f32.mrb[17].mxu0  ;;  %v3538_v9 = vadd.f32 %v959_v47, %v3360_v27  ;;  %v998_v35 = vadd.f32 %v3455_v23, %v997_v41 }
 0x19a   :  { %4207 = vst [vmem:[#allocation4_spill] sm:$0xff] %v3532_v53  ;;  %v3542_v54 = vadd.f32 %v887_v10, %v3312_v1  ;;  %1139 = vadd.xlane.f32.xlu1 %v1138_v37  ;;  %v1186_v15 = vadd.f32 %v1185_v60, %v1107_v24  ;;  %v1086_v1 = vmul.f32 %v3465_v21, %v3465_v21 }
 0x19b   :  { %4208 = vst [vmem:[#allocation5_spill] sm:$0xff] %v3535_v63  ;;  %4209 = vst [vmem:[#allocation6_spill] sm:$0xff] %v3538_v9  ;;  %1183 = vadd.xlane.f32.xlu0 %v1182_v57  ;;  %v963_v0 = vpop.f32.mrb[66].mxu1 }
 0x19c   :  { %4210 = vst [vmem:[#allocation7_spill] sm:$0xff] %v3542_v54  ;;  %v891_v31 = vpop.f32.mrb[18].mxu0  ;;  %v3549_v50 = vadd.f32 %v963_v0, %v3362_v33  ;;  %v965_v27 = vpop.f32.mrb[67].mxu1  ;;  %v1001_v33 = vsel %vm980_vm0, %v3485_v8, 0.0  ;;  %v1141_v24 = vsel %vm980_vm0, %v1086_v1, 0.0 }
 0x19d   :  { %v3556_v25 = vadd.f32 %v891_v31, %v3314_v2  ;;  %v893_v62 = vpop.f32.mrb[19].mxu0  ;;  %v3559_v18 = vadd.f32 %v965_v27, %v3364_v36  ;;  %v1002_v60 = vadd.f32 %v3475_v29, %v1001_v33  ;;  %v1046_v36 = vadd.f32 %v1045_v43, %v3452_v14 }
 0x19e   :  { %4211 = vst [vmem:[#allocation8_spill] sm:$0xff] %v3549_v50  ;;  %v3565_v47 = vadd.f32 %v893_v62, %v3316_v3  ;;  %1187 = vadd.xlane.f32.xlu1 %v1186_v15  ;;  %v1049_v31 = vsel %vm980_vm0, %v3478_v30, 0.0  ;;  %v1085_v15 = vmul.f32 %v3455_v23, %v3455_v23 }
 0x19f   :  { %4212 = vst [vmem:[#allocation9_spill] sm:$0xff] %v3559_v18  ;;  %999 = vadd.xlane.f32.xlu0 %v998_v35  ;;  %v969_v37 = vpop.f32.mrb[68].mxu1  ;;  %v1050_v35 = vadd.f32 %v1049_v31, %v3468_v56 }
 0x1a0   :  { %v897_v10 = vpop.f32.mrb[20].mxu0  ;;  %v3568_v57 = vadd.f32 %v969_v37, %v3366_v42  ;;  %v971_v2 = vpop.f32.mrb[69].mxu1  ;;  %v1088_v42 = vmul.f32 %v3485_v8, %v3485_v8  ;;  %v1142_v33 = vadd.f32 %v1141_v24, %v1085_v15  ;;  %v1005_v15 = vsel %vm980_vm0, %v3504_v26, 0.0 }
 0x1a1   :  { %v3574_v41 = vadd.f32 %v897_v10, %v3318_v4  ;;  %v899_v0 = vpop.f32.mrb[21].mxu0  ;;  %v3577_v3 = vadd.f32 %v971_v2, %v3368_v45  ;;  %v1110_v4 = vmul.f32 %v3458_v32, %v3458_v32 }
 0x1a2   :  { %4213 = vst [vmem:[#allocation10_spill] sm:$0xff] %v3568_v57  ;;  %v3584_v27 = vadd.f32 %v899_v0, %v3320_v5  ;;  %1003 = vadd.xlane.f32.xlu1 %v1002_v60  ;;  %v1145_v2 = vsel %vm980_vm0, %v1088_v42, 0.0  ;;  %v1112_v60 = vmul.f32 %v3478_v30, %v3478_v30  ;;  %v2244_v42 = vmov 0  }
 0x1a3   :  { %4214 = vst [vmem:[#allocation11_spill] sm:$0xff] %v3574_v41  ;;  %4215 = vst [vmem:[#allocation12_spill] sm:$0xff] %v3577_v3  ;;  %1047 = vadd.xlane.f32.xlu0 %v1046_v36  ;;  %v975_v43 = vpop.f32.mrb[70].mxu1  ;;  %v1189_v24 = vsel %vm980_vm0, %v1110_v4, 0.0  ;;  %2195 = vset.pattern.permute.xlu1 %v2244_v42 }
 0x1a4   :  { %4216 = vst [vmem:[#allocation13_spill] sm:$0xff] %v3584_v27  ;;  %v903_v45 = vpop.f32.mrb[22].mxu0  ;;  %v3591_v1 = vadd.f32 %v975_v43, %v3370_v12  ;;  %v977_v62 = vpop.f32.mrb[71].mxu1  ;;  %v1087_v12 = vmul.f32 %v3475_v29, %v3475_v29  ;;  %v1193_v31 = vsel %vm980_vm0, %v1112_v60, 0.0  ;;  %2194 = vset.pattern.permute.xlu0 %v2244_v42  ;;  %v1006_v43 = vadd.f32 %v3494_v17, %v1005_v15 }
 0x1a5   :  { %v3595_v5 = vadd.f32 %v903_v45, %v3322_v6  ;;  %v905_v37 = vpop.f32.mrb[23].mxu0  ;;  %v3598_v10 = vadd.f32 %v977_v62, %v3372_v16  ;;  %v1109_v6 = vmul.f32 %v3452_v14, %v3452_v14  ;;  %v1009_v45 = vsel %vm980_vm0, %v3524_v55, 0.0 }
 0x1a6   :  { %4217 = vst [vmem:[#allocation14_spill] sm:$0xff] %v3591_v1  ;;  %v3604_v36 = vadd.f32 %v905_v37, %v3324_v7  ;;  %1051 = vadd.xlane.f32.xlu1 %v1050_v35  ;;  %v1146_v16 = vadd.f32 %v1145_v2, %v1087_v12  ;;  %v1111_v7 = vmul.f32 %v3468_v56, %v3468_v56  ;;  %v1053_v62 = vsel %vm980_vm0, %v3497_v59, 0.0 }
 0x1a7   :  { %4218 = vst [vmem:[#allocation15_spill] sm:$0xff] %v3595_v5  ;;  %4219 = vst [vmem:[#allocation16_spill] sm:$0xff] %v3598_v10  ;;  %1143 = vadd.xlane.f32.xlu0 %v1142_v33  ;;  %v1190_v0 = vadd.f32 %v1189_v24, %v1109_v6  ;;  %v1090_v35 = vmul.f32 %v3504_v26, %v3504_v26  ;;  %v1010_v33 = vadd.f32 %v3515_v61, %v1009_v45 }
 0x1a8   :  { %4220 = vst [vmem:[#allocation17_spill] sm:$0xff] %v3604_v36  ;;  %v1194_v4 = vadd.f32 %v1193_v31, %v1111_v7  ;;  %v1054_v37 = vadd.f32 %v1053_v62, %v3488_v58  ;;  %v1057_v2 = vsel %vm980_vm0, %v3518_v52, 0.0  ;;  %v1092_v60 = vmul.f32 %v3524_v55, %v3524_v55 }
 0x1a9   :  { %v1149_v12 = vsel %vm980_vm0, %v1090_v35, 0.0  ;;  %v1114_v24 = vmul.f32 %v3497_v59, %v3497_v59  ;;  %v1089_v6 = vmul.f32 %v3494_v17, %v3494_v17  ;;  %v1116_v42 = vmul.f32 %v3518_v52, %v3518_v52 }
 0x1aa   :  { %1147 = vadd.xlane.f32.xlu1 %v1146_v16  ;;  %v1058_v16 = vadd.f32 %v1057_v2, %v3511_v11  ;;  %v1153_v31 = vsel %vm980_vm0, %v1092_v60, 0.0  ;;  %v1091_v7 = vmul.f32 %v3515_v61, %v3515_v61  ;;  %v1115_v35 = vmul.f32 %v3511_v11, %v3511_v11 }
 0x1ab   :  { %1191 = vadd.xlane.f32.xlu0 %v1190_v0  ;;  %v1150_v0 = vadd.f32 %v1149_v12, %v1089_v6  ;;  %v1197_v15 = vsel %vm980_vm0, %v1114_v24, 0.0  ;;  %v1201_v62 = vsel %vm980_vm0, %v1116_v42, 0.0  ;;  %v1017_v60 = vsel %vm980_vm0, %v3565_v47, 0.0 }
 0x1ac   :  { %v1061_v12 = vsel %vm980_vm0, %v3538_v9, 0.0  ;;  %v1094_v24 = vmul.f32 %v3542_v54, %v3542_v54  ;;  %v1018_v6 = vadd.f32 %v3556_v25, %v1017_v60 }
 0x1ae   :  { %1195 = vadd.xlane.f32.xlu1 %v1194_v4  ;;  %v1113_v4 = vmul.f32 %v3488_v58, %v3488_v58  ;;  %v1157_v42 = vsel %vm980_vm0, %v1094_v24, 0.0  ;;  %v1119_v24 = vmul.f32 %v3549_v50, %v3549_v50 }
 0x1af   :  { %1007 = vadd.xlane.f32.xlu0 %v1006_v43  ;;  %v1154_v43 = vadd.f32 %v1153_v31, %v1091_v7  ;;  %v1096_v31 = vmul.f32 %v3565_v47, %v3565_v47  ;;  %v1118_v7 = vmul.f32 %v3538_v9, %v3538_v9 }
 0x1b0   :  { %v1198_v45 = vadd.f32 %v1197_v15, %v1113_v4  ;;  %v1093_v15 = vmul.f32 %v3535_v63, %v3535_v63 }
 0x1b2   :  { %1011 = vadd.xlane.f32.xlu1 %v1010_v33  ;;  %v1013_v33 = vsel %vm980_vm0, %v3542_v54, 0.0 }
 0x1b3   :  { %1055 = vadd.xlane.f32.xlu0 %v1054_v37  ;;  %v1202_v37 = vadd.f32 %v1201_v62, %v1115_v35  ;;  %v1014_v2 = vadd.f32 %v3535_v63, %v1013_v33  ;;  %v1120_v62 = vmul.f32 %v3559_v18, %v3559_v18  ;;  %v1095_v35 = vmul.f32 %v3556_v25, %v3556_v25  ;;  %v1366_v63 = vld [vmem:[%s4186_s2 + $0x8] sm:$0xff] }
 0x1b4   :  { %v1205_v33 = vsel %vm980_vm0, %v1118_v7, 0.0  ;;  %v1098_v7 = vmul.f32 %v3584_v27, %v3584_v27 }
 0x1b6   :  { %1059 = vadd.xlane.f32.xlu1 %v1058_v16  ;;  %v1062_v16 = vadd.f32 %v1061_v12, %v3532_v53  ;;  %v1209_v12 = vsel %vm980_vm0, %v1120_v62, 0.0  ;;  %v1165_v62 = vsel %vm980_vm0, %v1098_v7, 0.0  ;;  %v1123_v7 = vmul.f32 %v3591_v1, %v3591_v1 }
 0x1b7   :  { %1151 = vadd.xlane.f32.xlu0 %v1150_v0  ;;  %v1065_v0 = vsel %vm980_vm0, %v3559_v18, 0.0 }
 0x1b8   :  { %v1066_v4 = vadd.f32 %v1065_v0, %v3549_v50 }
 0x1ba   :  { %1155 = vadd.xlane.f32.xlu1 %v1154_v43  ;;  %v1158_v43 = vadd.f32 %v1157_v42, %v1093_v15  ;;  %v1069_v42 = vsel %vm980_vm0, %v3577_v3, 0.0 }
 0x1bb   :  { %1199 = vadd.xlane.f32.xlu0 %v1198_v45  ;;  %v1161_v45 = vsel %vm980_vm0, %v1096_v31, 0.0  ;;  %v1025_v31 = vsel %vm980_vm0, %v3604_v36, 0.0 }
 0x1bc   :  { %v1026_v15 = vadd.f32 %v3595_v5, %v1025_v31 }
 0x1be   :  { %1203 = vadd.xlane.f32.xlu1 %v1202_v37  ;;  %v1117_v37 = vmul.f32 %v3532_v53, %v3532_v53 }
 0x1bf   :  { %1015 = vadd.xlane.f32.xlu0 %v1014_v2  ;;  %v1162_v2 = vadd.f32 %v1161_v45, %v1095_v35  ;;  %v1100_v45 = vmul.f32 %v3604_v36, %v3604_v36  ;;  %v1122_v35 = vmul.f32 %v3577_v3, %v3577_v3 }
 0x1c0   :  { %v1206_v60 = vadd.f32 %v1205_v33, %v1117_v37  ;;  %v1097_v33 = vmul.f32 %v3574_v41, %v3574_v41 }
 0x1c2   :  { %1019 = vadd.xlane.f32.xlu1 %v1018_v6  ;;  %v1021_v6 = vsel %vm980_vm0, %v3584_v27, 0.0 }
 0x1c3   :  { %1063 = vadd.xlane.f32.xlu0 %v1062_v16  ;;  %v1210_v16 = vadd.f32 %v1209_v12, %v1119_v24  ;;  %v1022_v0 = vadd.f32 %v3574_v41, %v1021_v6  ;;  %v1124_v12 = vmul.f32 %v3598_v10, %v3598_v10  ;;  %v1213_v24 = vsel %vm980_vm0, %v1122_v35, 0.0 }
 0x1c4   :  { %v1099_v6 = vmul.f32 %v3595_v5, %v3595_v5 }
 0x1c6   :  { %1067 = vadd.xlane.f32.xlu1 %v1066_v4  ;;  %v1070_v4 = vadd.f32 %v1069_v42, %v3568_v57  ;;  %v1217_v42 = vsel %vm980_vm0, %v1124_v12, 0.0 }
 0x1c7   :  { %1159 = vadd.xlane.f32.xlu0 %v1158_v43  ;;  %v1073_v43 = vsel %vm980_vm0, %v3598_v10, 0.0 }
 0x1c8   :  { %v1074_v37 = vadd.f32 %v1073_v43, %v3591_v1 }
 0x1ca   :  { %1163 = vadd.xlane.f32.xlu1 %v1162_v2  ;;  %v1166_v2 = vadd.f32 %v1165_v62, %v1097_v33 }
 0x1cb   :  { %1207 = vadd.xlane.f32.xlu0 %v1206_v60  ;;  %v1169_v60 = vsel %vm980_vm0, %v1100_v45, 0.0 }
 0x1ce   :  { %1211 = vadd.xlane.f32.xlu1 %v1210_v16  ;;  %v1121_v16 = vmul.f32 %v3568_v57, %v3568_v57 }
 0x1cf   :  { %1023 = vadd.xlane.f32.xlu0 %v1022_v0  ;;  %v1170_v0 = vadd.f32 %v1169_v60, %v1099_v6 }
 0x1d0   :  { %v1214_v31 = vadd.f32 %v1213_v24, %v1121_v16 }
 0x1d2   :  { %1027 = vadd.xlane.f32.xlu1 %v1026_v15  ;;  %v1218_v15 = vadd.f32 %v1217_v42, %v1123_v7 }
 0x1d3   :  { %1071 = vadd.xlane.f32.xlu0 %v1070_v4 }
 0x1d6   :  { %1075 = vadd.xlane.f32.xlu1 %v1074_v37 }
 0x1d7   :  { %1167 = vadd.xlane.f32.xlu0 %v1166_v2 }
 0x1da   :  { %1171 = vadd.xlane.f32.xlu1 %v1170_v0 }
 0x1db   :  { %1215 = vadd.xlane.f32.xlu0 %v1214_v31 }
 0x1de   :  { %1219 = vadd.xlane.f32.xlu1 %v1218_v15 }
 0x20c   :  { %v984_v4 = vpop.xlane.xlu0 %983 }
 0x20d   :  { %v3710_v62 = vmul.f32 0.0069444445, %v984_v4 }
 0x20f   :  { %v1036_v43 = vpop.xlane.xlu1 %1035  ;;  %v1269_v2 = vmul.f32 %v3710_v62, %v3710_v62 }
 0x210   :  { %v1032_v45 = vpop.xlane.xlu0 %1031  ;;  %v3712_v33 = vmul.f32 0.0069444445, %v1036_v43 }
 0x211   :  { %v3716_v60 = vmul.f32 0.0069444445, %v1032_v45 }
 0x212   :  { %v1282_v16 = vmul.f32 %v3712_v33, %v3712_v33 }
 0x213   :  { %v1132_v35 = vpop.xlane.xlu1 %1131  ;;  %v1281_v42 = vmul.f32 %v3716_v60, %v3716_v60 }
 0x214   :  { %v1128_v37 = vpop.xlane.xlu0 %1127 }
 0x215   :  { %v1245_v12 = vmul.f32 0.0069444445, %v1128_v37 }
 0x217   :  { %v1293_v24 = vsub.f32 %v1245_v12, %v1269_v2  ;;  %v1180_v6 = vpop.xlane.xlu1 %1179  ;;  %v1246_v2 = vmul.f32 0.0069444445, %v1132_v35 }
 0x218   :  { %v1258_v0 = vmul.f32 0.0069444445, %v1180_v6  ;;  %v1176_v31 = vpop.xlane.xlu0 %1175 }
 0x219   :  { %v1317_v7 = vadd.f32 0.001, %v1293_v24  ;;  %v1257_v15 = vmul.f32 0.0069444445, %v1176_v31 }
 0x21a   :  { %v1306_v4 = vsub.f32 %v1258_v0, %v1282_v16  ;;  %v1365_v16 = vld [vmem:[%s4186_s2] sm:$0xff] }
 0x21b   :  { %2196 = vrsqrt.f32 %v1317_v7  ;;  %v1305_v43 = vsub.f32 %v1257_v15, %v1281_v42  ;;  %v992_v3 = vpop.xlane.xlu1 %991 }
 0x21c   :  { %v1330_v57 = vadd.f32 0.001, %v1306_v4  ;;  %v988_v45 = vpop.xlane.xlu0 %987  ;;  %v3722_v10 = vmul.f32 0.0069444445, %v992_v3 }
 0x21d   :  { %v1329_v27 = vadd.f32 0.001, %v1305_v43  ;;  %v1222_v37 = vmul.f32 0.0069444445, %v988_v45 }
 0x21e   :  { %2198 = vrsqrt.f32 %v1330_v57  ;;  %v1271_v57 = vmul.f32 %v3722_v10, %v3722_v10 }
 0x21f   :  { %2200 = vrsqrt.f32 %v1329_v27  ;;  %v1270_v12 = vmul.f32 %v1222_v37, %v1222_v37  ;;  %v996_v41 = vpop.xlane.xlu1 %995 }
 0x220   :  { %v1040_v6 = vpop.xlane.xlu0 %1039  ;;  %v3727_v0 = vmul.f32 0.0069444445, %v996_v41  ;;  %v1377_v41 = vld [vmem:[%s4186_s2 + $0x60] sm:$0xff] }
 0x221   :  { %v1294_v1 = vsub.f32 %v1246_v2, %v1270_v12  ;;  %v3731_v27 = vmul.f32 0.0069444445, %v1040_v6 }
 0x222   :  { %v1272_v43 = vmul.f32 %v3727_v0, %v3727_v0 }
 0x223   :  { %v1318_v9 = vadd.f32 0.001, %v1294_v1  ;;  %v1044_v24 = vpop.xlane.xlu1 %1043  ;;  %v1378_v1 = vld [vmem:[%s4186_s2 + $0x68] sm:$0xff]  ;;  %v1283_v6 = vmul.f32 %v3731_v27, %v3731_v27 }
 0x224   :  { %v1136_v31 = vpop.xlane.xlu0 %1135  ;;  %v3741_v45 = vmul.f32 0.0069444445, %v1044_v24 }
 0x225   :  { %v2197_v42 = vpop.eup %2196  ;;  %2202 = vrsqrt.f32 %v1318_v9  ;;  %v1247_v35 = vmul.f32 0.0069444445, %v1136_v31 }
 0x226   :  { %v1389_v3 = vmul.f32 %v2197_v42, %v1365_v16  ;;  %v1284_v5 = vmul.f32 %v3741_v45, %v3741_v45 }
 0x227   :  { %v1295_v7 = vsub.f32 %v1247_v35, %v1271_v57  ;;  %v1140_v15 = vpop.xlane.xlu1 %1139 }
 0x228   :  { %v2199_v4 = vpop.eup %2198  ;;  %v1248_v9 = vmul.f32 0.0069444445, %v1140_v15  ;;  %1487 = vperm.xlu0 %2194, %v1389_v3   ;;  %v1184_v2 = vpop.xlane.xlu0 %1183 }
 0x229   :  { %v2201_v12 = vpop.eup %2200  ;;  %v1259_v16 = vmul.f32 0.0069444445, %v1184_v2  ;;  %v1402_v31 = vmul.f32 %v2199_v4, %v1378_v1  ;;  %v1319_v35 = vadd.f32 0.001, %v1295_v7 }
 0x22a   :  { %v1296_v42 = vsub.f32 %v1248_v9, %v1272_v43  ;;  %v1401_v57 = vmul.f32 %v2201_v12, %v1377_v41  ;;  %v1437_v12 = vmul.f32 %v1389_v3, %v3710_v62  ;;  %v1426_v3 = vld [vmem:[%s4187_s3 + $0x68] sm:$0xff] }
 0x22b   :  { %v1307_v53 = vsub.f32 %v1259_v16, %v1283_v6  ;;  %v1188_v36 = vpop.xlane.xlu1 %1187  ;;  %v1413_v6 = vld [vmem:[%s4187_s3] sm:$0xff] }
 0x22c   :  { %v1320_v54 = vadd.f32 0.001, %v1296_v42  ;;  %v1260_v24 = vmul.f32 0.0069444445, %v1188_v36  ;;  %1552 = vperm.xlu0 %2194, %v1402_v31   ;;  %v1000_v15 = vpop.xlane.xlu0 %999  ;;  %1547 = vperm.xlu1 %2195, %v1401_v57   ;;  %v1414_v36 = vld [vmem:[%s4187_s3 + $0x8] sm:$0xff]  ;;  %v1461_v62 = vsub.f32 %v1413_v6, %v1437_v12  ;;  %v1367_v6 = vld [vmem:[%s4186_s2 + $0x10] sm:$0xff] }
 0x22d   :  { %v1331_v41 = vadd.f32 0.001, %v1307_v53  ;;  %v1450_v53 = vmul.f32 %v1402_v31, %v3712_v33  ;;  %v1368_v33 = vld [vmem:[%s4186_s2 + $0x18] sm:$0xff] }
 0x22e   :  { %2204 = vrsqrt.f32 %v1320_v54  ;;  %v1308_v2 = vsub.f32 %v1260_v24, %v1284_v5  ;;  %v3764_v24 = vmul.f32 0.0069444445, %v1000_v15 }
 0x22f   :  { %v2203_v1 = vpop.eup %2202  ;;  %2206 = vrsqrt.f32 %v1319_v35  ;;  %v1004_v7 = vpop.xlane.xlu1 %1003  ;;  %v1449_v35 = vmul.f32 %v1401_v57, %v3716_v60 }
 0x230   :  { %v1390_v4 = vmul.f32 %v2203_v1, %v1366_v63  ;;  %v1332_v43 = vadd.f32 0.001, %v1308_v2  ;;  %v1048_v9 = vpop.xlane.xlu0 %1047  ;;  %v3758_v63 = vmul.f32 0.0069444445, %v1004_v7  ;;  %v1474_v1 = vsub.f32 %v1426_v3, %v1450_v53 }
 0x231   :  { %v1273_v12 = vmul.f32 %v3764_v24, %v3764_v24 }
 0x232   :  { %v1438_v16 = vmul.f32 %v1390_v4, %v1222_v37  ;;  %2208 = vrsqrt.f32 %v1332_v43  ;;  %1492 = vperm.xlu1 %2195, %v1390_v4   ;;  %v1425_v37 = vld [vmem:[%s4187_s3 + $0x60] sm:$0xff]  ;;  %v1274_v7 = vmul.f32 %v3758_v63, %v3758_v63 }
 0x233   :  { %2210 = vrsqrt.f32 %v1331_v41  ;;  %v1052_v54 = vpop.xlane.xlu1 %1051  ;;  %v1473_v4 = vsub.f32 %v1425_v37, %v1449_v35 }
 0x234   :  { %v1144_v5 = vpop.xlane.xlu0 %1143  ;;  %v1462_v42 = vsub.f32 %v1414_v36, %v1438_v16  ;;  %v3774_v60 = vmul.f32 0.0069444445, %v1052_v54  ;;  %v3778_v36 = vmul.f32 0.0069444445, %v1048_v9  ;;  %v1380_v54 = vld [vmem:[%s4186_s2 + $0x78] sm:$0xff] }
 0x235   :  { %v1249_v31 = vmul.f32 0.0069444445, %v1144_v5 }
 0x236   :  { %1660 = vperm.xlu0 %2194, %v1462_v42   ;;  %1655 = vperm.xlu1 %2195, %v1461_v62   ;;  %v1286_v9 = vmul.f32 %v3774_v60, %v3774_v60 }
 0x237   :  { %v1148_v2 = vpop.xlane.xlu1 %1147  ;;  %v1297_v5 = vsub.f32 %v1249_v31, %v1273_v12 }
 0x238   :  { %v2205_v41 = vpop.eup %2204  ;;  %v1250_v57 = vmul.f32 0.0069444445, %v1148_v2  ;;  %v1192_v15 = vpop.xlane.xlu0 %1191 }
 0x239   :  { %v2207_v43 = vpop.eup %2206  ;;  %v1392_v16 = vmul.f32 %v2205_v41, %v1368_v33  ;;  %v1261_v42 = vmul.f32 0.0069444445, %v1192_v15  ;;  %v1285_v33 = vmul.f32 %v3778_v36, %v3778_v36  ;;  %v1379_v41 = vld [vmem:[%s4186_s2 + $0x70] sm:$0xff]  ;;  %v1321_v15 = vadd.f32 0.001, %v1297_v5 }
 0x23a   :  { %v1298_v53 = vsub.f32 %v1250_v57, %v1274_v7  ;;  %1720 = vperm.xlu0 %2194, %v1474_v1   ;;  %1715 = vperm.xlu1 %2195, %v1473_v4   ;;  %v1391_v18 = vmul.f32 %v2207_v43, %v1367_v6  ;;  %v1416_v57 = vld [vmem:[%s4187_s3 + $0x18] sm:$0xff] }
 0x23b   :  { %v1196_v62 = vpop.xlane.xlu1 %1195  ;;  %v1440_v31 = vmul.f32 %v1392_v16, %v3727_v0  ;;  %v1309_v4 = vsub.f32 %v1261_v42, %v1285_v33  ;;  %v1428_v0 = vld [vmem:[%s4187_s3 + $0x78] sm:$0xff] }
 0x23c   :  { %v2209_v3 = vpop.eup %2208  ;;  %v1322_v35 = vadd.f32 0.001, %v1298_v53  ;;  %v1262_v37 = vmul.f32 0.0069444445, %v1196_v62  ;;  %v1008_v2 = vpop.xlane.xlu0 %1007  ;;  %v1439_v5 = vmul.f32 %v1391_v18, %v3722_v10 }
 0x23d   :  { %v2211_v50 = vpop.eup %2210  ;;  %v1404_v1 = vmul.f32 %v2209_v3, %v1380_v54  ;;  %v1464_v54 = vsub.f32 %v1416_v57, %v1440_v31  ;;  %v1333_v3 = vadd.f32 0.001, %v1309_v4 }
 0x23e   :  { %2212 = vrsqrt.f32 %v1322_v35  ;;  %v1310_v7 = vsub.f32 %v1262_v37, %v1286_v9  ;;  %1497 = vperm.xlu1 %2195, %v1391_v18   ;;  %v1403_v53 = vmul.f32 %v2211_v50, %v1379_v41  ;;  %v1415_v50 = vld [vmem:[%s4187_s3 + $0x10] sm:$0xff]  ;;  %v1370_v37 = vld [vmem:[%s4186_s2 + $0x28] sm:$0xff] }
 0x23f   :  { %v1012_v43 = vpop.xlane.xlu1 %1011  ;;  %1562 = vperm.xlu0 %2194, %v1404_v1   ;;  %v1452_v62 = vmul.f32 %v1404_v1, %v3741_v45  ;;  %v1463_v1 = vsub.f32 %v1415_v50, %v1439_v5 }
 0x240   :  { %v1334_v12 = vadd.f32 0.001, %v1310_v7  ;;  %v1056_v6 = vpop.xlane.xlu0 %1055  ;;  %v3802_v42 = vmul.f32 0.0069444445, %v1012_v43  ;;  %v1451_v57 = vmul.f32 %v1403_v53, %v3731_v27 }
 0x241   :  { %v1476_v45 = vsub.f32 %v1428_v0, %v1452_v62 }
 0x242   :  { %2214 = vrsqrt.f32 %v1334_v12  ;;  %1557 = vperm.xlu1 %2195, %v1403_v53   ;;  %v1276_v18 = vmul.f32 %v3802_v42, %v3802_v42  ;;  %v1382_v12 = vld [vmem:[%s4186_s2 + $0x88] sm:$0xff] }
 0x243   :  { %2216 = vrsqrt.f32 %v1321_v15  ;;  %v1060_v9 = vpop.xlane.xlu1 %1059  ;;  %1670 = vperm.xlu0 %2194, %v1464_v54   ;;  %v3815_v15 = vmul.f32 0.0069444445, %v1008_v2 }
 0x244   :  { %v1152_v35 = vpop.xlane.xlu0 %1151  ;;  %2218 = vrsqrt.f32 %v1333_v3  ;;  %v3812_v10 = vmul.f32 0.0069444445, %v1060_v9 }
 0x245   :  { %v1251_v54 = vmul.f32 0.0069444445, %v1152_v35  ;;  %v1275_v50 = vmul.f32 %v3815_v15, %v3815_v15  ;;  %v1369_v35 = vld [vmem:[%s4186_s2 + $0x20] sm:$0xff] }
 0x246   :  { %1502 = vperm.xlu1 %2195, %v1392_v16   ;;  %v1427_v16 = vld [vmem:[%s4187_s3 + $0x70] sm:$0xff]  ;;  %v1288_v3 = vmul.f32 %v3812_v10, %v3812_v10 }
 0x247   :  { %v1156_v33 = vpop.xlane.xlu1 %1155  ;;  %1730 = vperm.xlu0 %2194, %v1476_v45   ;;  %v1475_v9 = vsub.f32 %v1427_v16, %v1451_v57  ;;  %v3827_v45 = vmul.f32 0.0069444445, %v1056_v6 }
 0x248   :  { %v2213_v41 = vpop.eup %2212  ;;  %v1252_v31 = vmul.f32 0.0069444445, %v1156_v33  ;;  %v1200_v7 = vpop.xlane.xlu0 %1199 }
 0x249   :  { %v1394_v4 = vmul.f32 %v2213_v41, %v1370_v37  ;;  %v1418_v41 = vld [vmem:[%s4187_s3 + $0x28] sm:$0xff] }
 0x24a   :  { %v1300_v43 = vsub.f32 %v1252_v31, %v1276_v18  ;;  %1665 = vperm.xlu1 %2195, %v1463_v1   ;;  %v1299_v18 = vsub.f32 %v1251_v54, %v1275_v50  ;;  %v1263_v31 = vmul.f32 0.0069444445, %v1200_v7  ;;  %v1430_v7 = vld [vmem:[%s4187_s3 + $0x88] sm:$0xff] }
 0x24b   :  { %v1204_v62 = vpop.xlane.xlu1 %1203  ;;  %v1442_v33 = vmul.f32 %v1394_v4, %v3758_v63  ;;  %v1381_v63 = vld [vmem:[%s4186_s2 + $0x80] sm:$0xff] }
 0x24c   :  { %v2215_v0 = vpop.eup %2214  ;;  %v1324_v27 = vadd.f32 0.001, %v1300_v43  ;;  %v1264_v2 = vmul.f32 0.0069444445, %v1204_v62  ;;  %v1016_v53 = vpop.xlane.xlu0 %1015  ;;  %v1287_v62 = vmul.f32 %v3827_v45, %v3827_v45  ;;  %v1323_v54 = vadd.f32 0.001, %v1299_v18 }
 0x24d   :  { %v2217_v5 = vpop.eup %2216  ;;  %v1406_v37 = vmul.f32 %v2215_v0, %v1382_v12  ;;  %v1466_v0 = vsub.f32 %v1418_v41, %v1442_v33 }
 0x24e   :  { %2220 = vrsqrt.f32 %v1324_v27  ;;  %v1312_v1 = vsub.f32 %v1264_v2, %v1288_v3  ;;  %1725 = vperm.xlu1 %2195, %v1475_v9   ;;  %v1393_v43 = vmul.f32 %v2217_v5, %v1369_v35  ;;  %v2219_v12 = vpop.eup %2218  ;;  %v1311_v27 = vsub.f32 %v1263_v31, %v1287_v62 }
 0x24f   :  { %v1020_v57 = vpop.xlane.xlu1 %1019  ;;  %1572 = vperm.xlu0 %2194, %v1406_v37   ;;  %v1454_v3 = vmul.f32 %v1406_v37, %v3774_v60  ;;  %v1405_v50 = vmul.f32 %v2219_v12, %v1381_v63  ;;  %v1372_v60 = vld [vmem:[%s4186_s2 + $0x38] sm:$0xff]  ;;  %v1417_v12 = vld [vmem:[%s4187_s3 + $0x20] sm:$0xff] }
 0x250   :  { %v1336_v6 = vadd.f32 0.001, %v1312_v1  ;;  %v1064_v16 = vpop.xlane.xlu0 %1063  ;;  %v3845_v9 = vmul.f32 0.0069444445, %v1020_v57  ;;  %v1335_v37 = vadd.f32 0.001, %v1311_v27  ;;  %v1441_v1 = vmul.f32 %v1393_v43, %v3764_v24 }
 0x251   :  { %v1478_v35 = vsub.f32 %v1430_v7, %v1454_v3  ;;  %v1384_v24 = vld [vmem:[%s4186_s2 + $0x98] sm:$0xff] }
 0x252   :  { %2222 = vrsqrt.f32 %v1336_v6  ;;  %1507 = vperm.xlu1 %2195, %v1393_v43   ;;  %v1278_v18 = vmul.f32 %v3845_v9, %v3845_v9  ;;  %v1465_v63 = vsub.f32 %v1417_v12, %v1441_v1 }
 0x253   :  { %v1068_v2 = vpop.xlane.xlu1 %1067  ;;  %1680 = vperm.xlu0 %2194, %v1466_v0   ;;  %2224 = vrsqrt.f32 %v1323_v54 }
 0x254   :  { %v1160_v5 = vpop.xlane.xlu0 %1159  ;;  %v3853_v31 = vmul.f32 0.0069444445, %v1068_v2  ;;  %2226 = vrsqrt.f32 %v1335_v37  ;;  %v1453_v2 = vmul.f32 %v1405_v50, %v3778_v36 }
 0x256   :  { %1567 = vperm.xlu1 %2195, %v1405_v50   ;;  %v1290_v7 = vmul.f32 %v3853_v31, %v3853_v31 }
 0x257   :  { %v1164_v33 = vpop.xlane.xlu1 %1163  ;;  %1740 = vperm.xlu0 %2194, %v1478_v35   ;;  %v3866_v35 = vmul.f32 0.0069444445, %v1016_v53 }
 0x258   :  { %v2221_v41 = vpop.eup %2220  ;;  %v1254_v57 = vmul.f32 0.0069444445, %v1164_v33  ;;  %v1208_v6 = vpop.xlane.xlu0 %1207 }
 0x259   :  { %v3858_v62 = vmul.f32 %v2221_v41, %v1372_v60  ;;  %v1420_v41 = vld [vmem:[%s4187_s3 + $0x38] sm:$0xff]  ;;  %v1277_v12 = vmul.f32 %v3866_v35, %v3866_v35 }
 0x25a   :  { %v1302_v0 = vsub.f32 %v1254_v57, %v1278_v18  ;;  %1512 = vperm.xlu1 %2195, %v1394_v4   ;;  %v1429_v4 = vld [vmem:[%s4187_s3 + $0x80] sm:$0xff]  ;;  %v1253_v18 = vmul.f32 0.0069444445, %v1160_v5  ;;  %v1432_v5 = vld [vmem:[%s4187_s3 + $0x98] sm:$0xff] }
 0x25b   :  { %v1212_v43 = vpop.xlane.xlu1 %1211  ;;  %v1444_v37 = vmul.f32 %v3858_v62, %v3802_v42  ;;  %v1477_v50 = vsub.f32 %v1429_v4, %v1453_v2 }
 0x25c   :  { %v2223_v3 = vpop.eup %2222  ;;  %v1326_v54 = vadd.f32 0.001, %v1302_v0  ;;  %v1266_v27 = vmul.f32 0.0069444445, %v1212_v43  ;;  %v1024_v1 = vpop.xlane.xlu0 %1023  ;;  %v3878_v0 = vmul.f32 0.0069444445, %v1064_v16 }
 0x25d   :  { %v1408_v60 = vmul.f32 %v2223_v3, %v1384_v24  ;;  %v2225_v57 = vpop.eup %2224  ;;  %v1468_v42 = vsub.f32 %v1420_v41, %v1444_v37  ;;  %v1371_v24 = vld [vmem:[%s4186_s2 + $0x30] sm:$0xff]  ;;  %v1265_v3 = vmul.f32 0.0069444445, %v1208_v6  ;;  %v1374_v6 = vld [vmem:[%s4186_s2 + $0x48] sm:$0xff] }
 0x25e   :  { %2228 = vrsqrt.f32 %v1326_v54  ;;  %v1314_v33 = vsub.f32 %v1266_v27, %v1290_v7  ;;  %1675 = vperm.xlu1 %2195, %v1465_v63   ;;  %v1301_v63 = vsub.f32 %v1253_v18, %v1277_v12  ;;  %v1395_v27 = vmul.f32 %v2225_v57, %v1371_v24  ;;  %v2227_v2 = vpop.eup %2226 }
 0x25f   :  { %v1028_v36 = vpop.xlane.xlu1 %1027  ;;  %1582 = vperm.xlu0 %2194, %v1408_v60   ;;  %v1456_v43 = vmul.f32 %v1408_v60, %v3812_v10  ;;  %v1289_v4 = vmul.f32 %v3878_v0, %v3878_v0  ;;  %v1383_v10 = vld [vmem:[%s4186_s2 + $0x90] sm:$0xff] }
 0x260   :  { %v1338_v53 = vadd.f32 0.001, %v1314_v33  ;;  %v3887_v54 = vmul.f32 0.0069444445, %v1028_v36  ;;  %v1072_v16 = vpop.xlane.xlu0 %1071  ;;  %v1325_v60 = vadd.f32 0.001, %v1301_v63  ;;  %v1407_v57 = vmul.f32 %v2227_v2, %v1383_v10 }
 0x261   :  { %v1480_v37 = vsub.f32 %v1432_v5, %v1456_v43  ;;  %v1313_v33 = vsub.f32 %v1265_v3, %v1289_v4  ;;  %v1386_v43 = vld [vmem:[%s4186_s2 + $0xa8] sm:$0xff]  ;;  %v1443_v2 = vmul.f32 %v1395_v27, %v3815_v15  ;;  %v3907_v10 = vmul.f32 0.0069444445, %v1024_v1 }
 0x262   :  { %2230 = vrsqrt.f32 %v1338_v53  ;;  %1735 = vperm.xlu1 %2195, %v1477_v50   ;;  %v1280_v36 = vmul.f32 %v3887_v54, %v3887_v54 }
 0x263   :  { %1690 = vperm.xlu0 %2194, %v1468_v42   ;;  %v1076_v7 = vpop.xlane.xlu1 %1075  ;;  %2232 = vrsqrt.f32 %v1325_v60  ;;  %v1337_v5 = vadd.f32 0.001, %v1313_v33 }
 0x264   :  { %v3899_v53 = vmul.f32 0.0069444445, %v1076_v7  ;;  %v1168_v42 = vpop.xlane.xlu0 %1167 }
 0x266   :  { %1517 = vperm.xlu1 %2195, %v1395_v27   ;;  %v1292_v4 = vmul.f32 %v3899_v53, %v3899_v53 }
 0x267   :  { %1750 = vperm.xlu0 %2194, %v1480_v37   ;;  %v1172_v41 = vpop.xlane.xlu1 %1171 }
 0x268   :  { %v2229_v18 = vpop.eup %2228  ;;  %v1256_v50 = vmul.f32 0.0069444445, %v1172_v41  ;;  %v1419_v41 = vld [vmem:[%s4187_s3 + $0x30] sm:$0xff]  ;;  %v1216_v15 = vpop.xlane.xlu0 %1215 }
 0x269   :  { %v1398_v12 = vmul.f32 %v2229_v18, %v1374_v6  ;;  %v1422_v18 = vld [vmem:[%s4187_s3 + $0x48] sm:$0xff]  ;;  %v1467_v27 = vsub.f32 %v1419_v41, %v1443_v2 }
 0x26a   :  { %v1304_v24 = vsub.f32 %v1256_v50, %v1280_v36  ;;  %1577 = vperm.xlu1 %2195, %v1407_v57   ;;  %v1255_v36 = vmul.f32 0.0069444445, %v1168_v42  ;;  %v1455_v50 = vmul.f32 %v1407_v57, %v3827_v45  ;;  %v1434_v42 = vld [vmem:[%s4187_s3 + $0xa8] sm:$0xff] }
 0x26b   :  { %1532 = vperm.xlu0 %2194, %v1398_v12   ;;  %v1220_v63 = vpop.xlane.xlu1 %1219  ;;  %v1446_v60 = vmul.f32 %v1398_v12, %v3845_v9  ;;  %v1243_v9 = vmul.f32 0.0069444445, %v1072_v16 }
 0x26c   :  { %v2231_v3 = vpop.eup %2230  ;;  %v1328_v7 = vadd.f32 0.001, %v1304_v24  ;;  %v1268_v37 = vmul.f32 0.0069444445, %v1220_v63  ;;  %v1279_v24 = vmul.f32 %v3907_v10, %v3907_v10  ;;  %v1267_v63 = vmul.f32 0.0069444445, %v1216_v15 }
 0x26d   :  { %v1410_v6 = vmul.f32 %v2231_v3, %v1386_v43  ;;  %v1470_v12 = vsub.f32 %v1422_v18, %v1446_v60  ;;  %v2233_v57 = vpop.eup %2232  ;;  %v1291_v3 = vmul.f32 %v1243_v9, %v1243_v9  ;;  %v1388_v18 = vld [vmem:[%s4186_s2 + $0xb8] sm:$0xff] }
 0x26e   :  { %2234 = vrsqrt.f32 %v1328_v7  ;;  %v1316_v33 = vsub.f32 %v1268_v37, %v1292_v4  ;;  %1522 = vperm.xlu1 %2195, %v3858_v62   ;;  %v1431_v62 = vld [vmem:[%s4187_s3 + $0x90] sm:$0xff]  ;;  %v1373_v4 = vld [vmem:[%s4186_s2 + $0x40] sm:$0xff] }
 0x26f   :  { %2236 = vrsqrt.f32 %v1337_v5  ;;  %1592 = vperm.xlu0 %2194, %v1410_v6   ;;  %v1458_v43 = vmul.f32 %v1410_v6, %v3853_v31  ;;  %v1303_v5 = vsub.f32 %v1255_v36, %v1279_v24  ;;  %v1479_v45 = vsub.f32 %v1431_v62, %v1455_v50  ;;  %v1376_v31 = vld [vmem:[%s4186_s2 + $0x58] sm:$0xff]  ;;  %v1421_v24 = vld [vmem:[%s4187_s3 + $0x40] sm:$0xff] }
 0x270   :  { %v1340_v1 = vadd.f32 0.001, %v1316_v33  ;;  %v1315_v37 = vsub.f32 %v1267_v63, %v1291_v3  ;;  %v1397_v6 = vmul.f32 %v2233_v57, %v1373_v4  ;;  %v1385_v33 = vld [vmem:[%s4186_s2 + $0xa0] sm:$0xff]  ;;  %v1424_v62 = vld [vmem:[%s4187_s3 + $0x58] sm:$0xff] }
 0x271   :  { %v1482_v16 = vsub.f32 %v1434_v42, %v1458_v43  ;;  %v1327_v7 = vadd.f32 0.001, %v1303_v5 }
 0x272   :  { %2238 = vrsqrt.f32 %v1340_v1  ;;  %1685 = vperm.xlu1 %2195, %v1467_v27   ;;  %v1339_v36 = vadd.f32 0.001, %v1315_v37  ;;  %v1445_v27 = vmul.f32 %v1397_v6, %v3866_v35  ;;  %v1433_v35 = vld [vmem:[%s4187_s3 + $0xa0] sm:$0xff]  ;;  %v1423_v37 = vld [vmem:[%s4187_s3 + $0x50] sm:$0xff] }
 0x273   :  { %1700 = vperm.xlu0 %2194, %v1470_v12   ;;  %2240 = vrsqrt.f32 %v1327_v7 }
 0x274   :  { %2242 = vrsqrt.f32 %v1339_v36  ;;  %v1469_v43 = vsub.f32 %v1421_v24, %v1445_v27 }
 0x276   :  { %1745 = vperm.xlu1 %2195, %v1479_v45  }
 0x277   :  { %1760 = vperm.xlu0 %2194, %v1482_v16  }
 0x278   :  { %v2235_v2 = vpop.eup %2234 }
 0x279   :  { %v2237_v41 = vpop.eup %2236  ;;  %v1400_v60 = vmul.f32 %v2235_v2, %v1376_v31 }
 0x27a   :  { %1527 = vperm.xlu1 %2195, %v1397_v6   ;;  %v1409_v1 = vmul.f32 %v2237_v41, %v1385_v33  ;;  %v1435_v41 = vld [vmem:[%s4187_s3 + $0xb0] sm:$0xff] }
 0x27b   :  { %1542 = vperm.xlu0 %2194, %v1400_v60   ;;  %v1448_v12 = vmul.f32 %v1400_v60, %v3887_v54  ;;  %v1436_v54 = vld [vmem:[%s4187_s3 + $0xb8] sm:$0xff] }
 0x27c   :  { %v2239_v15 = vpop.eup %2238  ;;  %v1457_v42 = vmul.f32 %v1409_v1, %v3878_v0  ;;  %v1375_v0 = vld [vmem:[%s4186_s2 + $0x50] sm:$0xff] }
 0x27d   :  { %v1412_v50 = vmul.f32 %v2239_v15, %v1388_v18  ;;  %v1472_v5 = vsub.f32 %v1424_v62, %v1448_v12  ;;  %v2241_v57 = vpop.eup %2240 }
 0x27e   :  { %1587 = vperm.xlu1 %2195, %v1409_v1   ;;  %v1481_v45 = vsub.f32 %v1433_v35, %v1457_v42  ;;  %v1399_v16 = vmul.f32 %v2241_v57, %v1375_v0  ;;  %v2243_v4 = vpop.eup %2242  ;;  %v4221_v35 = vld [vmem:[#allocation3_spill] sm:$0xff] }
 0x27f   :  { %1602 = vperm.xlu0 %2194, %v1412_v50   ;;  %v1460_v63 = vmul.f32 %v1412_v50, %v3899_v53  ;;  %v1387_v53 = vld [vmem:[%s4186_s2 + $0xb0] sm:$0xff] }
 0x280   :  { %v1447_v31 = vmul.f32 %v1399_v16, %v3907_v10  ;;  %v1411_v7 = vmul.f32 %v2243_v4, %v1387_v53 }
 0x281   :  { %v1484_v3 = vsub.f32 %v1436_v54, %v1460_v63 }
 0x282   :  { %1695 = vperm.xlu1 %2195, %v1469_v43   ;;  %v1459_v2 = vmul.f32 %v1411_v7, %v1243_v9  ;;  %v1471_v6 = vsub.f32 %v1423_v37, %v1447_v31 }
 0x283   :  { %1710 = vperm.xlu0 %2194, %v1472_v5  }
 0x284   :  { %v1483_v60 = vsub.f32 %v1435_v41, %v1459_v2 }
 0x286   :  { %1755 = vperm.xlu1 %2195, %v1481_v45   ;;  %v4222_v45 = vld [vmem:[#allocation2_spill] sm:$0xff] }
 0x287   :  { %1770 = vperm.xlu0 %2194, %v1484_v3  }
 0x28a   :  { %1537 = vperm.xlu1 %2195, %v1399_v16  }
 0x28e   :  { %1597 = vperm.xlu1 %2195, %v1411_v7  }
 0x292   :  { %1705 = vperm.xlu1 %2195, %v1471_v6  }
 0x296   :  { %1765 = vperm.xlu1 %2195, %v1483_v60  }
 0x2a7   :  { %v1488_v33 = vpop.permute.xlu0 %1487 }
 0x2a8   :  { %v1605_v10 = vmul.f32 %v3378_v28, %v1488_v33  ;;  %v1606_v1 = vmul.f32 %v3384_v34, %v1488_v33 }
 0x2ab   :  { %v1548_v18 = vpop.permute.xlu1 %1547  ;;  %v1553_v36 = vpop.permute.xlu0 %1552 }
 0x2ac   :  { %v1631_v5 = vmul.f32 %v1553_v36, %v3387_v40  ;;  %v1632_v63 = vmul.f32 %v1553_v36, %v4221_v35  ;;  %v1629_v54 = vmul.f32 %v1548_v18, %v3375_v22  ;;  %v1630_v28 = vmul.f32 %v1548_v18, %v4222_v45 }
 0x2b1   :  { %v1493_v15 = vpop.permute.xlu1 %1492 }
 0x2b2   :  { %v1607_v27 = vmul.f32 %v3392_v48, %v1493_v15  ;;  %v1608_v9 = vmul.f32 %v3399_v49, %v1493_v15 }
 0x2b5   :  { %v1661_v50 = vpop.permute.xlu0 %1660  ;;  %v1656_v24 = vpop.permute.xlu1 %1655 }
 0x2b6   :  { %v1775_v12 = vadd.f32 %v1661_v50, %v1607_v27  ;;  %v1776_v62 = vadd.f32 %v1661_v50, %v1608_v9  ;;  %v1773_v43 = vadd.f32 %v1656_v24, %v1605_v10  ;;  %v1774_v42 = vadd.f32 %v1656_v24, %v1606_v1 }
 0x2b8   :  { %1823 = vst [vmem:[%s4188_s4 + $0x10] sm:$0xff] %v1775_v12  ;;  %1824 = vst.msk [vmem:[%s4188_s4 + $0x18] sm:$0xff] %vm980_vm0, %v1776_v62 }
 0x2b9   :  { %1821 = vst [vmem:[%s4188_s4] sm:$0xff] %v1773_v43  ;;  %1822 = vst.msk [vmem:[%s4188_s4 + $0x8] sm:$0xff] %vm980_vm0, %v1774_v42  ;;  %v1721_v22 = vpop.permute.xlu0 %1720  ;;  %v1716_v34 = vpop.permute.xlu1 %1715 }
 0x2ba   :  { %v1799_v40 = vadd.f32 %v1721_v22, %v1631_v5  ;;  %v1800_v48 = vadd.f32 %v1721_v22, %v1632_v63  ;;  %v1797_v49 = vadd.f32 %v1716_v34, %v1629_v54  ;;  %v1798_v57 = vadd.f32 %v1716_v34, %v1630_v28 }
 0x2bc   :  { %1847 = vst [vmem:[%s4188_s4 + $0xd0] sm:$0xff] %v1799_v40  ;;  %1848 = vst.msk [vmem:[%s4188_s4 + $0xd8] sm:$0xff] %vm980_vm0, %v1800_v48 }
 0x2bd   :  { %1845 = vst [vmem:[%s4188_s4 + $0xc0] sm:$0xff] %v1797_v49  ;;  %1846 = vst.msk [vmem:[%s4188_s4 + $0xc8] sm:$0xff] %vm980_vm0, %v1798_v57  ;;  %v1498_v3 = vpop.permute.xlu1 %1497 }
 0x2be   :  { %v1563_v0 = vpop.permute.xlu0 %1562  ;;  %v1609_v33 = vmul.f32 %v3416_v38, %v1498_v3  ;;  %v1610_v18 = vmul.f32 %v3425_v46, %v1498_v3 }
 0x2bf   :  { %v1635_v53 = vmul.f32 %v1563_v0, %v3434_v20  ;;  %v1636_v31 = vmul.f32 %v1563_v0, %v3441_v51 }
 0x2c1   :  { %v1558_v16 = vpop.permute.xlu1 %1557 }
 0x2c2   :  { %v1671_v4 = vpop.permute.xlu0 %1670  ;;  %v1633_v46 = vmul.f32 %v1558_v16, %v3408_v19 }
 0x2c5   :  { %v1503_v7 = vpop.permute.xlu1 %1502 }
 0x2c6   :  { %v1611_v37 = vmul.f32 %v3438_v39, %v1503_v7  ;;  %v1612_v2 = vmul.f32 %v3445_v13, %v1503_v7  ;;  %v1731_v6 = vpop.permute.xlu0 %1730  ;;  %v1634_v39 = vmul.f32 %v1558_v16, %v3419_v44 }
 0x2c7   :  { %v1803_v41 = vadd.f32 %v1731_v6, %v1635_v53  ;;  %v1804_v60 = vadd.f32 %v1731_v6, %v1636_v31 }
 0x2c8   :  { %v1779_v36 = vadd.f32 %v1671_v4, %v1611_v37  ;;  %v1780_v15 = vadd.f32 %v1671_v4, %v1612_v2 }
 0x2c9   :  { %1851 = vst [vmem:[%s4188_s4 + $0xf0] sm:$0xff] %v1803_v41  ;;  %1852 = vst.msk [vmem:[%s4188_s4 + $0xf8] sm:$0xff] %vm980_vm0, %v1804_v60  ;;  %v1666_v20 = vpop.permute.xlu1 %1665 }
 0x2ca   :  { %1827 = vst [vmem:[%s4188_s4 + $0x30] sm:$0xff] %v1779_v36  ;;  %1828 = vst.msk [vmem:[%s4188_s4 + $0x38] sm:$0xff] %vm980_vm0, %v1780_v15  ;;  %v1777_v13 = vadd.f32 %v1666_v20, %v1609_v33  ;;  %v1778_v38 = vadd.f32 %v1666_v20, %v1610_v18  ;;  %v4224_v20 = vld [vmem:[#allocation9_spill] sm:$0xff] }
 0x2cc   :  { %1825 = vst [vmem:[%s4188_s4 + $0x20] sm:$0xff] %v1777_v13  ;;  %1826 = vst.msk [vmem:[%s4188_s4 + $0x28] sm:$0xff] %vm980_vm0, %v1778_v38 }
 0x2cd   :  { %v1726_v51 = vpop.permute.xlu1 %1725 }
 0x2ce   :  { %v1801_v10 = vadd.f32 %v1726_v51, %v1633_v46  ;;  %v1802_v1 = vadd.f32 %v1726_v51, %v1634_v39  ;;  %v1573_v27 = vpop.permute.xlu0 %1572 }
 0x2cf   :  { %v1639_v9 = vmul.f32 %v1573_v27, %v3468_v56  ;;  %v1640_v50 = vmul.f32 %v1573_v27, %v3478_v30 }
 0x2d0   :  { %1849 = vst [vmem:[%s4188_s4 + $0xe0] sm:$0xff] %v1801_v10  ;;  %1850 = vst.msk [vmem:[%s4188_s4 + $0xe8] sm:$0xff] %vm980_vm0, %v1802_v1 }
 0x2d1   :  { %v1508_v19 = vpop.permute.xlu1 %1507 }
 0x2d2   :  { %v1681_v44 = vpop.permute.xlu0 %1680  ;;  %v1613_v30 = vmul.f32 %v3455_v23, %v1508_v19  ;;  %v1614_v35 = vmul.f32 %v3465_v21, %v1508_v19 }
 0x2d5   :  { %v1568_v24 = vpop.permute.xlu1 %1567 }
 0x2d6   :  { %v1741_v12 = vpop.permute.xlu0 %1740  ;;  %v1638_v23 = vmul.f32 %v1568_v24, %v3458_v32 }
 0x2d7   :  { %v1807_v62 = vadd.f32 %v1741_v12, %v1639_v9  ;;  %v1808_v43 = vadd.f32 %v1741_v12, %v1640_v50  ;;  %v4226_v50 = vld [vmem:[#allocation7_spill] sm:$0xff] }
 0x2d8   :  { %v4227_v12 = vld [vmem:[#allocation15_spill] sm:$0xff] }
 0x2d9   :  { %1855 = vst [vmem:[%s4188_s4 + $0x110] sm:$0xff] %v1807_v62  ;;  %1856 = vst.msk [vmem:[%s4188_s4 + $0x118] sm:$0xff] %vm980_vm0, %v1808_v43  ;;  %v1513_v42 = vpop.permute.xlu1 %1512  ;;  %v4228_v43 = vld [vmem:[#allocation17_spill] sm:$0xff] }
 0x2da   :  { %v1615_v5 = vmul.f32 %v3475_v29, %v1513_v42  ;;  %v1616_v56 = vmul.f32 %v3485_v8, %v1513_v42  ;;  %v1637_v8 = vmul.f32 %v1568_v24, %v3452_v14 }
 0x2dc   :  { %v1783_v63 = vadd.f32 %v1681_v44, %v1615_v5  ;;  %v1784_v54 = vadd.f32 %v1681_v44, %v1616_v56  ;;  %v4225_v44 = vld [vmem:[#allocation5_spill] sm:$0xff] }
 0x2dd   :  { %v1676_v45 = vpop.permute.xlu1 %1675 }
 0x2de   :  { %1831 = vst [vmem:[%s4188_s4 + $0x50] sm:$0xff] %v1783_v63  ;;  %1832 = vst.msk [vmem:[%s4188_s4 + $0x58] sm:$0xff] %vm980_vm0, %v1784_v54  ;;  %v1781_v28 = vadd.f32 %v1676_v45, %v1613_v30  ;;  %v1782_v29 = vadd.f32 %v1676_v45, %v1614_v35  ;;  %v1583_v22 = vpop.permute.xlu0 %1582  ;;  %v4229_v45 = vld [vmem:[#allocation4_spill] sm:$0xff] }
 0x2df   :  { %v1643_v14 = vmul.f32 %v1583_v22, %v3511_v11  ;;  %v1644_v32 = vmul.f32 %v1583_v22, %v3518_v52 }
 0x2e0   :  { %1829 = vst [vmem:[%s4188_s4 + $0x40] sm:$0xff] %v1781_v28  ;;  %1830 = vst.msk [vmem:[%s4188_s4 + $0x48] sm:$0xff] %vm980_vm0, %v1782_v29  ;;  %v4230_v29 = vld [vmem:[#allocation6_spill] sm:$0xff] }
 0x2e1   :  { %v1736_v21 = vpop.permute.xlu1 %1735 }
 0x2e2   :  { %v1805_v34 = vadd.f32 %v1736_v21, %v1637_v8  ;;  %v1806_v40 = vadd.f32 %v1736_v21, %v1638_v23  ;;  %v1691_v48 = vpop.permute.xlu0 %1690  ;;  %v4231_v8 = vld [vmem:[#allocation14_spill] sm:$0xff]  ;;  %v4232_v21 = vld [vmem:[#allocation16_spill] sm:$0xff] }
 0x2e4   :  { %1853 = vst [vmem:[%s4188_s4 + $0x100] sm:$0xff] %v1805_v34  ;;  %1854 = vst.msk [vmem:[%s4188_s4 + $0x108] sm:$0xff] %vm980_vm0, %v1806_v40 }
 0x2e5   :  { %v1518_v49 = vpop.permute.xlu1 %1517 }
 0x2e6   :  { %v1751_v57 = vpop.permute.xlu0 %1750  ;;  %v1617_v7 = vmul.f32 %v3494_v17, %v1518_v49  ;;  %v1618_v37 = vmul.f32 %v3504_v26, %v1518_v49 }
 0x2e7   :  { %v1811_v3 = vadd.f32 %v1751_v57, %v1643_v14  ;;  %v1812_v0 = vadd.f32 %v1751_v57, %v1644_v32 }
 0x2e9   :  { %1859 = vst [vmem:[%s4188_s4 + $0x130] sm:$0xff] %v1811_v3  ;;  %1860 = vst.msk [vmem:[%s4188_s4 + $0x138] sm:$0xff] %vm980_vm0, %v1812_v0  ;;  %v1578_v16 = vpop.permute.xlu1 %1577 }
 0x2ea   :  { %v1533_v4 = vpop.permute.xlu0 %1532  ;;  %v1641_v36 = vmul.f32 %v1578_v16, %v3488_v58 }
 0x2eb   :  { %v1623_v41 = vmul.f32 %v3556_v25, %v1533_v4  ;;  %v1624_v60 = vmul.f32 %v3565_v47, %v1533_v4  ;;  %v1642_v25 = vmul.f32 %v1578_v16, %v3497_v59  ;;  %v4223_v47 = vld [vmem:[#allocation8_spill] sm:$0xff]  ;;  %v4233_v16 = vld [vmem:[#allocation11_spill] sm:$0xff] }
 0x2ed   :  { %v1523_v53 = vpop.permute.xlu1 %1522 }
 0x2ee   :  { %v1619_v11 = vmul.f32 %v3515_v61, %v1523_v53  ;;  %v1620_v52 = vmul.f32 %v3524_v55, %v1523_v53  ;;  %v1593_v31 = vpop.permute.xlu0 %1592  ;;  %v4234_v53 = vld [vmem:[#allocation13_spill] sm:$0xff] }
 0x2ef   :  { %v1647_v15 = vmul.f32 %v1593_v31, %v4223_v47  ;;  %v1648_v13 = vmul.f32 %v1593_v31, %v4224_v20 }
 0x2f0   :  { %v1787_v2 = vadd.f32 %v1691_v48, %v1619_v11  ;;  %v1788_v6 = vadd.f32 %v1691_v48, %v1620_v52 }
 0x2f1   :  { %v1686_v33 = vpop.permute.xlu1 %1685 }
 0x2f2   :  { %1835 = vst [vmem:[%s4188_s4 + $0x70] sm:$0xff] %v1787_v2  ;;  %1836 = vst.msk [vmem:[%s4188_s4 + $0x78] sm:$0xff] %vm980_vm0, %v1788_v6  ;;  %v1785_v61 = vadd.f32 %v1686_v33, %v1617_v7  ;;  %v1786_v17 = vadd.f32 %v1686_v33, %v1618_v37  ;;  %v1701_v55 = vpop.permute.xlu0 %1700  ;;  %v4235_v37 = vld [vmem:[#allocation10_spill] sm:$0xff]  ;;  %v4236_v6 = vld [vmem:[#allocation12_spill] sm:$0xff] }
 0x2f3   :  { %v1791_v26 = vadd.f32 %v1701_v55, %v1623_v41  ;;  %v1792_v18 = vadd.f32 %v1701_v55, %v1624_v60 }
 0x2f4   :  { %1833 = vst [vmem:[%s4188_s4 + $0x60] sm:$0xff] %v1785_v61  ;;  %1834 = vst.msk [vmem:[%s4188_s4 + $0x68] sm:$0xff] %vm980_vm0, %v1786_v17 }
 0x2f5   :  { %1839 = vst [vmem:[%s4188_s4 + $0x90] sm:$0xff] %v1791_v26  ;;  %1840 = vst.msk [vmem:[%s4188_s4 + $0x98] sm:$0xff] %vm980_vm0, %v1792_v18  ;;  %v1746_v58 = vpop.permute.xlu1 %1745 }
 0x2f6   :  { %v1809_v59 = vadd.f32 %v1746_v58, %v1641_v36  ;;  %v1810_v38 = vadd.f32 %v1746_v58, %v1642_v25  ;;  %v1761_v46 = vpop.permute.xlu0 %1760 }
 0x2f7   :  { %v1815_v39 = vadd.f32 %v1761_v46, %v1647_v15  ;;  %v1816_v51 = vadd.f32 %v1761_v46, %v1648_v13 }
 0x2f8   :  { %1857 = vst [vmem:[%s4188_s4 + $0x120] sm:$0xff] %v1809_v59  ;;  %1858 = vst.msk [vmem:[%s4188_s4 + $0x128] sm:$0xff] %vm980_vm0, %v1810_v38 }
 0x2f9   :  { %1863 = vst [vmem:[%s4188_s4 + $0x150] sm:$0xff] %v1815_v39  ;;  %1864 = vst.msk [vmem:[%s4188_s4 + $0x158] sm:$0xff] %vm980_vm0, %v1816_v51  ;;  %v1528_v10 = vpop.permute.xlu1 %1527 }
 0x2fa   :  { %v1543_v1 = vpop.permute.xlu0 %1542  ;;  %v1621_v9 = vmul.f32 %v4225_v44, %v1528_v10  ;;  %v1622_v24 = vmul.f32 %v4226_v50, %v1528_v10 }
 0x2fb   :  { %v1627_v62 = vmul.f32 %v4227_v12, %v1543_v1  ;;  %v1628_v42 = vmul.f32 %v4228_v43, %v1543_v1 }
 0x2fd   :  { %v1588_v27 = vpop.permute.xlu1 %1587 }
 0x2fe   :  { %v1603_v19 = vpop.permute.xlu0 %1602  ;;  %v1645_v28 = vmul.f32 %v1588_v27, %v4229_v45  ;;  %v1646_v22 = vmul.f32 %v1588_v27, %v4230_v29 }
 0x2ff   :  { %v1651_v23 = vmul.f32 %v1603_v19, %v4231_v8  ;;  %v1652_v34 = vmul.f32 %v1603_v19, %v4232_v21 }
 0x301   :  { %v1696_v5 = vpop.permute.xlu1 %1695 }
 0x302   :  { %v1789_v56 = vadd.f32 %v1696_v5, %v1621_v9  ;;  %v1790_v30 = vadd.f32 %v1696_v5, %v1622_v24  ;;  %v1711_v35 = vpop.permute.xlu0 %1710 }
 0x303   :  { %v1795_v63 = vadd.f32 %v1711_v35, %v1627_v62  ;;  %v1796_v54 = vadd.f32 %v1711_v35, %v1628_v42 }
 0x304   :  { %1837 = vst [vmem:[%s4188_s4 + $0x80] sm:$0xff] %v1789_v56  ;;  %1838 = vst.msk [vmem:[%s4188_s4 + $0x88] sm:$0xff] %vm980_vm0, %v1790_v30 }
 0x305   :  { %1843 = vst [vmem:[%s4188_s4 + $0xb0] sm:$0xff] %v1795_v63  ;;  %1844 = vst.msk [vmem:[%s4188_s4 + $0xb8] sm:$0xff] %vm980_vm0, %v1796_v54  ;;  %v1756_v40 = vpop.permute.xlu1 %1755 }
 0x306   :  { %v1813_v48 = vadd.f32 %v1756_v40, %v1645_v28  ;;  %v1814_v14 = vadd.f32 %v1756_v40, %v1646_v22  ;;  %v1771_v32 = vpop.permute.xlu0 %1770 }
 0x307   :  { %v1819_v49 = vadd.f32 %v1771_v32, %v1651_v23  ;;  %v1820_v57 = vadd.f32 %v1771_v32, %v1652_v34 }
 0x308   :  { %1861 = vst [vmem:[%s4188_s4 + $0x140] sm:$0xff] %v1813_v48  ;;  %1862 = vst.msk [vmem:[%s4188_s4 + $0x148] sm:$0xff] %vm980_vm0, %v1814_v14 }
 0x309   :  { %1867 = vst [vmem:[%s4188_s4 + $0x170] sm:$0xff] %v1819_v49  ;;  %1868 = vst.msk [vmem:[%s4188_s4 + $0x178] sm:$0xff] %vm980_vm0, %v1820_v57  ;;  %v1538_v3 = vpop.permute.xlu1 %1537 }
 0x30a   :  { %v1625_v4 = vmul.f32 %v4233_v16, %v1538_v3  ;;  %v1626_v11 = vmul.f32 %v4234_v53, %v1538_v3 }
 0x30d   :  { %v1598_v0 = vpop.permute.xlu1 %1597 }
 0x30e   :  { %v1649_v2 = vmul.f32 %v1598_v0, %v4235_v37  ;;  %v1650_v41 = vmul.f32 %v1598_v0, %v4236_v6 }
 0x311   :  { %v1706_v52 = vpop.permute.xlu1 %1705 }
 0x312   :  { %v1793_v31 = vadd.f32 %v1706_v52, %v1625_v4  ;;  %v1794_v7 = vadd.f32 %v1706_v52, %v1626_v11 }
 0x314   :  { %1841 = vst [vmem:[%s4188_s4 + $0xa0] sm:$0xff] %v1793_v31  ;;  %1842 = vst.msk [vmem:[%s4188_s4 + $0xa8] sm:$0xff] %vm980_vm0, %v1794_v7 }
 0x315   :  { %v1766_v60 = vpop.permute.xlu1 %1765 }
 0x316   :  { %v1817_v33 = vadd.f32 %v1766_v60, %v1649_v2  ;;  %v1818_v61 = vadd.f32 %v1766_v60, %v1650_v41 }
 0x318   :  { %1865 = vst [vmem:[%s4188_s4 + $0x160] sm:$0xff] %v1817_v33  ;;  %1866 = vst.msk [vmem:[%s4188_s4 + $0x168] sm:$0xff] %vm980_vm0, %v1818_v61 }

</bundles_post_ra>
